<compile_context>
chip_gen: v6e
topology: v6e:2x2x1
jax: 0.10.0
libtpu: 0.0.40
codegen_flags: <defaults>
</compile_context>

<pallas_src>
import functools

import jax
import jax.numpy as jnp
from jax.experimental import pallas as pl
from jax.experimental.pallas import tpu as pltpu

LANE = 128
SUBLANE = 8


def _round_up(n, m):
    return (n + m - 1) // m * m


def _lstm_kernel(num_layers, seq_len, hidden, *refs):
    """Packed-gate multi-layer LSTM recurrence + final FC for one batch tile, all in vregs."""
    x0_ref = refs[0]                                   # (T, BT, G4) f32: x @ W_ih0^T + b0 (precomputed)
    whh0_ref = refs[1]                                 # (H, G4) bf16
    layer_refs = refs[2:2 + 3 * (num_layers - 1)]      # per layer>0: wih (H,G4) bf16, whh (H,G4) bf16, b (1,G4) f32
    wfc_ref = refs[2 + 3 * (num_layers - 1)]           # (H, OUTP) bf16
    bfc_ref = refs[3 + 3 * (num_layers - 1)]           # (1, OUTP) f32
    out_ref = refs[4 + 3 * (num_layers - 1)]           # (BT, OUTP) f32

    T, BT, G4 = x0_ref.shape
    H = hidden

    # Lane masks for the packed [i | f | g | o] gate layout, hoisted out of all loops.
    # sigmoid(x) = 0.5*tanh(0.5*x) + 0.5  ->  one tanh over the packed vreg covers all
    # four gates: scale i/f/o lanes by 0.5 before the tanh, rescale + offset after.
    col = jax.lax.broadcasted_iota(jnp.int32, (BT, G4), 1)
    is_g = jnp.logical_and(col >= 2 * H, col < 3 * H)
    pre_scale = jnp.where(is_g, jnp.float32(1.0), jnp.float32(0.5))
    post_scale = pre_scale
    post_shift = jnp.where(is_g, jnp.float32(0.0), jnp.float32(0.5))

    def run_layer(proj_steps, whh):
        # proj_steps: list of T (BT, G4) f32 pre-activations (x-part + bias), held in vregs.
        # whh: (H, G4) bf16, loaded once per layer and held across the unrolled T loop.
        h = jnp.zeros((BT, H), jnp.float32)
        c = jnp.zeros((BT, H), jnp.float32)
        hs = []
        for t in range(T):   # T is small & static -> fully unrolled straight-line code
            gates = proj_steps[t] + jnp.dot(h.astype(jnp.bfloat16), whh,
                                            preferred_element_type=jnp.float32)   # (BT, G4)
            tg = jnp.tanh(gates * pre_scale)            # single EUP op for all 4 gates
            act = tg * post_scale + post_shift          # i/f/o -> sigmoid, g -> tanh
            i_g = act[:, 0 * H:1 * H]
            f_g = act[:, 1 * H:2 * H]
            g_g = act[:, 2 * H:3 * H]
            o_g = act[:, 3 * H:4 * H]
            c = f_g * c + i_g * g_g
            h = o_g * jnp.tanh(c)
            hs.append(h)
        return h, hs

    # ---- Layer 0: pre-activations already include x @ W_ih^T + (b_ih + b_hh). ----
    x0 = x0_ref[...]                                    # one lane-dense bulk load
    h_last, hs = run_layer([x0[t] for t in range(T)], whh0_ref[...])

    # ---- Layers 1..L-1: hoisted full-sequence input projection, kept in vregs. ----
    for layer in range(1, num_layers):
        wih = layer_refs[3 * (layer - 1)][...]
        whh = layer_refs[3 * (layer - 1) + 1][...]
        bias = layer_refs[3 * (layer - 1) + 2][...]
        xin = jnp.concatenate(hs, axis=0)               # (T*BT, H) f32, stays in vregs
        proj = jnp.dot(xin.astype(jnp.bfloat16), wih,
                       preferred_element_type=jnp.float32) + bias      # (T*BT, G4)
        h_last, hs = run_layer([proj[t * BT:(t + 1) * BT, :] for t in range(T)], whh)

    # ---- h_out[-1] -> fully connected layer. OUTP lane-dense -> unmasked store. ----
    out = jnp.dot(h_last.astype(jnp.bfloat16), wfc_ref[...],
                  preferred_element_type=jnp.float32) + bfc_ref[...]
    # TODO(synk): nn.Dropout(p=0.2) is stochastic in training mode; applied as identity (eval semantics).
    out_ref[...] = out


def lstm_forward(x, params, *, hidden_size, num_layers, output_size, input_size):
    """x: (B, T, input_size) float32, batch_first like the PyTorch module."""
    B, T, I = x.shape
    H = hidden_size
    G4 = _round_up(4 * H, LANE)                   # packed gate width (== 4H for H=32)
    out_feats = output_size * input_size
    OUTP = _round_up(out_feats, LANE)             # lane-dense FC output

    # Batch tiling: grow the tile with the real batch; keep >= 2 grid points when the
    # batch allows so both v7x TensorCores get work.
    BP = _round_up(B, SUBLANE)
    if BP > SUBLANE:
        BT = min(128, _round_up((BP + 1) // 2, SUBLANE))
    else:
        BT = SUBLANE
    BP = _round_up(BP, BT)
    nbt = BP // BT

    hp = jax.lax.Precision.HIGHEST

    def packed_cols(w):                            # (rows, 4H) -> (rows, G4)
        return jnp.pad(w, ((0, 0), (0, G4 - 4 * H)))

    # ---- Layer-0 input projection hoisted to XLA (lane-sparse K=I stays off the MXU path). ----
    w_ih0, w_hh0, b_ih0, b_hh0 = params["layer0"]
    proj0 = jnp.einsum("bti,gi->tbg", x.astype(jnp.float32),
                       jnp.asarray(w_ih0, jnp.float32), precision=hp)
    proj0 = proj0 + jnp.asarray(b_ih0 + b_hh0, jnp.float32)[None, None, :]   # (T, B, 4H)
    proj0 = jnp.pad(proj0, ((0, 0), (0, BP - B), (0, G4 - 4 * H)))           # (T, BP, G4)

    whh0 = packed_cols(jnp.asarray(w_hh0, jnp.float32).T).astype(jnp.bfloat16)   # (H, G4)

    kernel_inputs = [proj0, whh0]
    in_specs = [
        pl.BlockSpec((T, BT, G4), lambda b: (0, b, 0)),
        pl.BlockSpec((H, G4), lambda b: (0, 0)),
    ]

    for layer in range(1, num_layers):
        w_ih, w_hh, b_ih, b_hh = params[f"layer{layer}"]
        wih = packed_cols(jnp.asarray(w_ih, jnp.float32).T).astype(jnp.bfloat16)   # (H, G4)
        whh = packed_cols(jnp.asarray(w_hh, jnp.float32).T).astype(jnp.bfloat16)   # (H, G4)
        bias = packed_cols(jnp.asarray(b_ih + b_hh, jnp.float32)[None, :])         # (1, G4)
        kernel_inputs += [wih, whh, bias]
        in_specs += [
            pl.BlockSpec((H, G4), lambda b: (0, 0)),
            pl.BlockSpec((H, G4), lambda b: (0, 0)),
            pl.BlockSpec((1, G4), lambda b: (0, 0)),
        ]

    w_fc, b_fc = params["fc"]
    wfc = jnp.pad(jnp.asarray(w_fc, jnp.float32).T,
                  ((0, 0), (0, OUTP - out_feats))).astype(jnp.bfloat16)            # (H, OUTP)
    bfc = jnp.pad(jnp.asarray(b_fc, jnp.float32)[None, :],
                  ((0, 0), (0, OUTP - out_feats)))                                 # (1, OUTP)
    kernel_inputs += [wfc, bfc]
    in_specs += [pl.BlockSpec((H, OUTP), lambda b: (0, 0)),
                 pl.BlockSpec((1, OUTP), lambda b: (0, 0))]

    # Advisory cost hint for XLA's scheduler around the custom call.
    flops = (2 * nbt * BT * T * H * 4 * H * (2 * num_layers - 1)   # recurrence + inter-layer proj
             + 2 * nbt * BT * H * OUTP)                            # FC
    transcendentals = nbt * num_layers * T * BT * (G4 + H)
    bytes_accessed = (int(proj0.size) + BP * OUTP) * 4 + sum(
        int(a.size) * a.dtype.itemsize for a in kernel_inputs[1:])
    cost = pl.CostEstimate(flops=int(flops), transcendentals=int(transcendentals),
                           bytes_accessed=int(bytes_accessed))

    kernel = functools.partial(_lstm_kernel, num_layers, T, H)

    out_p = pl.pallas_call(
        kernel,
        out_shape=jax.ShapeDtypeStruct((BP, OUTP), jnp.float32),
        grid_spec=pltpu.PrefetchScalarGridSpec(
            num_scalar_prefetch=0,
            grid=(nbt,),
            in_specs=in_specs,
            out_specs=pl.BlockSpec((BT, OUTP), lambda b: (b, 0)),
        ),
        compiler_params=pltpu.CompilerParams(
            # Independent batch tiles -> shard across TensorCores on v7x.
            dimension_semantics=("parallel",),
        ),
        cost_estimate=cost,
    )(*kernel_inputs)

    return out_p[:B, :out_feats].reshape(B, output_size, input_size)


def lstm_reference(x, params, *, hidden_size, num_layers, output_size, input_size):
    """Pure-JAX f32 re-implementation of the PyTorch module's forward (validation only)."""
    B, T, _ = x.shape
    H = hidden_size
    hp = jax.lax.Precision.HIGHEST
    seq = x.astype(jnp.float32)
    h = jnp.zeros((B, H), jnp.float32)
    for layer in range(num_layers):
        w_ih, w_hh, b_ih, b_hh = params[f"layer{layer}"]
        h = jnp.zeros((B, H), jnp.float32)
        c = jnp.zeros((B, H), jnp.float32)
        outs = []
        for t in range(T):
            gates = (jnp.dot(seq[:, t, :], w_ih.T, precision=hp) + b_ih
                     + jnp.dot(h, w_hh.T, precision=hp) + b_hh)
            i_g = jax.nn.sigmoid(gates[:, 0:H])
            f_g = jax.nn.sigmoid(gates[:, H:2 * H])
            g_g = jnp.tanh(gates[:, 2 * H:3 * H])
            o_g = jax.nn.sigmoid(gates[:, 3 * H:4 * H])
            c = f_g * c + i_g * g_g
            h = o_g * jnp.tanh(c)
            outs.append(h)
        seq = jnp.stack(outs, axis=1)
    w_fc, b_fc = params["fc"]
    out = jnp.dot(h, w_fc.T, precision=hp) + b_fc
    return out.reshape(B, output_size, input_size)


def init_params(key, input_size, hidden_size, num_layers, output_size):
    """Deterministic PyTorch-style init: U(-1/sqrt(H), 1/sqrt(H)), PyTorch weight shapes."""
    k = 1.0 / (hidden_size ** 0.5)
    params = {}
    for layer in range(num_layers):
        in_dim = input_size if layer == 0 else hidden_size
        key, k1, k2, k3, k4 = jax.random.split(key, 5)
        params[f"layer{layer}"] = (
            jax.random.uniform(k1, (4 * hidden_size, in_dim), jnp.float32, -k, k),
            jax.random.uniform(k2, (4 * hidden_size, hidden_size), jnp.float32, -k, k),
            jax.random.uniform(k3, (4 * hidden_size,), jnp.float32, -k, k),
            jax.random.uniform(k4, (4 * hidden_size,), jnp.float32, -k, k),
        )
    key, k1, k2 = jax.random.split(key, 3)
    out_feats = output_size * input_size
    params["fc"] = (
        jax.random.uniform(k1, (out_feats, hidden_size), jnp.float32, -k, k),
        jax.random.uniform(k2, (out_feats,), jnp.float32, -k, k),
    )
    return params


if __name__ == "__main__":
    batch, seq_len = 2, 8
    input_size, hidden_size, num_layers, output_size = 4, 32, 2, 1

    key = jax.random.PRNGKey(0)
    key, xkey = jax.random.split(key)
    x = jax.random.normal(xkey, (batch, seq_len, input_size), jnp.float32)

    params = init_params(key, input_size, hidden_size, num_layers, output_size)

    out = lstm_forward(
        x, params,
        hidden_size=hidden_size, num_layers=num_layers,
        output_size=output_size, input_size=input_size,
    )
    out = jax.block_until_ready(out)

    ref = lstm_reference(
        x, params,
        hidden_size=hidden_size, num_layers=num_layers,
        output_size=output_size, input_size=input_size,
    )

    assert out.shape == (batch, output_size, input_size)
    assert bool(jnp.all(jnp.isfinite(out)))
    assert float(jnp.max(jnp.abs(out - ref))) < 5e-2   # bf16-MXU drift tolerance vs f32 reference
    print("KERNEL_OK")
</pallas_src>

<mosaic_0001>
module attributes {stable_mosaic.version = 11 : i64} {
  func.func @_lstm_kernel(%arg0: i32, %arg1: memref<8x8x128xf32, #tpu.memory_space<vmem>>, %arg2: memref<32x128xbf16, #tpu.memory_space<vmem>>, %arg3: memref<32x128xbf16, #tpu.memory_space<vmem>>, %arg4: memref<32x128xbf16, #tpu.memory_space<vmem>>, %arg5: memref<1x128xf32, #tpu.memory_space<vmem>>, %arg6: memref<32x128xbf16, #tpu.memory_space<vmem>>, %arg7: memref<1x128xf32, #tpu.memory_space<vmem>>, %arg8: memref<8x128xf32, #tpu.memory_space<vmem>>) attributes {dimension_semantics = [#tpu.dimension_semantics<parallel>], iteration_bounds = array<i64: 1>, scalar_prefetch = 0 : i64, scratch_operands = 0 : i64, tpu.core_type = #tpu.core_type<tc>, window_params = [{transform_indices = @transform_0, window_bounds = array<i64: 8, 8, 128>}, {pipeline_mode = #tpu.pipeline_mode<synchronous>, transform_indices = @transform_1, window_bounds = array<i64: 32, 128>}, {pipeline_mode = #tpu.pipeline_mode<synchronous>, transform_indices = @transform_2, window_bounds = array<i64: 32, 128>}, {pipeline_mode = #tpu.pipeline_mode<synchronous>, transform_indices = @transform_3, window_bounds = array<i64: 32, 128>}, {pipeline_mode = #tpu.pipeline_mode<synchronous>, transform_indices = @transform_4, window_bounds = array<i64: 1, 128>}, {pipeline_mode = #tpu.pipeline_mode<synchronous>, transform_indices = @transform_5, window_bounds = array<i64: 32, 128>}, {pipeline_mode = #tpu.pipeline_mode<synchronous>, transform_indices = @transform_6, window_bounds = array<i64: 1, 128>}, {transform_indices = @transform_7, window_bounds = array<i64: 8, 128>}]} {
    %0 = tpu.iota {dimensions = array<i32: 1>} : vector<8x128xi32>
    %c64_i32 = arith.constant 64 : i32
    %1 = vector.broadcast %c64_i32 : i32 to vector<8x128xi32>
    %2 = arith.cmpi sge, %0, %1 : vector<8x128xi32>
    %c96_i32 = arith.constant 96 : i32
    %3 = vector.broadcast %c96_i32 : i32 to vector<8x128xi32>
    %4 = arith.cmpi slt, %0, %3 : vector<8x128xi32>
    %5 = arith.andi %2, %4 : vector<8x128xi1>
    %cst = arith.constant 1.000000e+00 : f32
    %cst_0 = arith.constant 5.000000e-01 : f32
    %6 = vector.broadcast %cst : f32 to vector<8x128xf32>
    %7 = vector.broadcast %cst_0 : f32 to vector<8x128xf32>
    %8 = arith.select %5, %6, %7 : vector<8x128xi1>, vector<8x128xf32>
    %cst_1 = arith.constant 0.000000e+00 : f32
    %cst_2 = arith.constant 5.000000e-01 : f32
    %9 = vector.broadcast %cst_1 : f32 to vector<8x128xf32>
    %10 = vector.broadcast %cst_2 : f32 to vector<8x128xf32>
    %11 = arith.select %5, %9, %10 : vector<8x128xi1>, vector<8x128xf32>
    %c0 = arith.constant 0 : index
    %c0_3 = arith.constant 0 : index
    %c0_4 = arith.constant 0 : index
    %12 = vector.load %arg1[%c0, %c0_3, %c0_4] : memref<8x8x128xf32, #tpu.memory_space<vmem>>, vector<8x8x128xf32>
    %13 = vector.extract_strided_slice %12 {offsets = [0, 0, 0], sizes = [1, 8, 128], strides = [1, 1, 1]} : vector<8x8x128xf32> to vector<1x8x128xf32>
    %14 = vector.shape_cast %13 : vector<1x8x128xf32> to vector<8x128xf32>
    %15 = vector.extract_strided_slice %12 {offsets = [1, 0, 0], sizes = [1, 8, 128], strides = [1, 1, 1]} : vector<8x8x128xf32> to vector<1x8x128xf32>
    %16 = vector.shape_cast %15 : vector<1x8x128xf32> to vector<8x128xf32>
    %17 = vector.extract_strided_slice %12 {offsets = [2, 0, 0], sizes = [1, 8, 128], strides = [1, 1, 1]} : vector<8x8x128xf32> to vector<1x8x128xf32>
    %18 = vector.shape_cast %17 : vector<1x8x128xf32> to vector<8x128xf32>
    %19 = vector.extract_strided_slice %12 {offsets = [3, 0, 0], sizes = [1, 8, 128], strides = [1, 1, 1]} : vector<8x8x128xf32> to vector<1x8x128xf32>
    %20 = vector.shape_cast %19 : vector<1x8x128xf32> to vector<8x128xf32>
    %21 = vector.extract_strided_slice %12 {offsets = [4, 0, 0], sizes = [1, 8, 128], strides = [1, 1, 1]} : vector<8x8x128xf32> to vector<1x8x128xf32>
    %22 = vector.shape_cast %21 : vector<1x8x128xf32> to vector<8x128xf32>
    %23 = vector.extract_strided_slice %12 {offsets = [5, 0, 0], sizes = [1, 8, 128], strides = [1, 1, 1]} : vector<8x8x128xf32> to vector<1x8x128xf32>
    %24 = vector.shape_cast %23 : vector<1x8x128xf32> to vector<8x128xf32>
    %25 = vector.extract_strided_slice %12 {offsets = [6, 0, 0], sizes = [1, 8, 128], strides = [1, 1, 1]} : vector<8x8x128xf32> to vector<1x8x128xf32>
    %26 = vector.shape_cast %25 : vector<1x8x128xf32> to vector<8x128xf32>
    %27 = vector.extract_strided_slice %12 {offsets = [7, 0, 0], sizes = [1, 8, 128], strides = [1, 1, 1]} : vector<8x8x128xf32> to vector<1x8x128xf32>
    %28 = vector.shape_cast %27 : vector<1x8x128xf32> to vector<8x128xf32>
    %c0_5 = arith.constant 0 : index
    %c0_6 = arith.constant 0 : index
    %29 = vector.load %arg2[%c0_5, %c0_6] : memref<32x128xbf16, #tpu.memory_space<vmem>>, vector<32x128xbf16>
    %cst_7 = arith.constant 0.000000e+00 : f32
    %30 = vector.broadcast %cst_7 : f32 to vector<8x32xf32>
    %cst_8 = arith.constant 0.000000e+00 : f32
    %31 = vector.broadcast %cst_8 : f32 to vector<8x32xf32>
    %32 = arith.truncf %30 : vector<8x32xf32> to vector<8x32xbf16>
    %cst_9 = arith.constant dense<0.000000e+00> : vector<8x128xf32>
    %33 = tpu.matmul %32, %29, %cst_9 {dimension_numbers = #tpu.dot_dimension_numbers<[1], [0], [0], [1], [0, 0, 1, 1], [], []>} : vector<8x32xbf16>, vector<32x128xbf16>, vector<8x128xf32> -> vector<8x128xf32>
    %34 = arith.addf %14, %33 : vector<8x128xf32>
    %35 = arith.mulf %34, %8 : vector<8x128xf32>
    %36 = math.tanh %35 : vector<8x128xf32>
    %37 = arith.mulf %36, %8 : vector<8x128xf32>
    %38 = arith.addf %37, %11 : vector<8x128xf32>
    %39 = vector.extract_strided_slice %38 {offsets = [0, 0], sizes = [8, 32], strides = [1, 1]} : vector<8x128xf32> to vector<8x32xf32>
    %40 = vector.extract_strided_slice %38 {offsets = [0, 32], sizes = [8, 32], strides = [1, 1]} : vector<8x128xf32> to vector<8x32xf32>
    %41 = vector.extract_strided_slice %38 {offsets = [0, 64], sizes = [8, 32], strides = [1, 1]} : vector<8x128xf32> to vector<8x32xf32>
    %42 = vector.extract_strided_slice %38 {offsets = [0, 96], sizes = [8, 32], strides = [1, 1]} : vector<8x128xf32> to vector<8x32xf32>
    %43 = arith.mulf %40, %31 : vector<8x32xf32>
    %44 = arith.mulf %39, %41 : vector<8x32xf32>
    %45 = arith.addf %43, %44 : vector<8x32xf32>
    %46 = math.tanh %45 : vector<8x32xf32>
    %47 = arith.mulf %42, %46 : vector<8x32xf32>
    %48 = arith.truncf %47 : vector<8x32xf32> to vector<8x32xbf16>
    %cst_10 = arith.constant dense<0.000000e+00> : vector<8x128xf32>
    %49 = tpu.matmul %48, %29, %cst_10 {dimension_numbers = #tpu.dot_dimension_numbers<[1], [0], [0], [1], [0, 0, 1, 1], [], []>} : vector<8x32xbf16>, vector<32x128xbf16>, vector<8x128xf32> -> vector<8x128xf32>
    %50 = arith.addf %16, %49 : vector<8x128xf32>
    %51 = arith.mulf %50, %8 : vector<8x128xf32>
    %52 = math.tanh %51 : vector<8x128xf32>
    %53 = arith.mulf %52, %8 : vector<8x128xf32>
    %54 = arith.addf %53, %11 : vector<8x128xf32>
    %55 = vector.extract_strided_slice %54 {offsets = [0, 0], sizes = [8, 32], strides = [1, 1]} : vector<8x128xf32> to vector<8x32xf32>
    %56 = vector.extract_strided_slice %54 {offsets = [0, 32], sizes = [8, 32], strides = [1, 1]} : vector<8x128xf32> to vector<8x32xf32>
    %57 = vector.extract_strided_slice %54 {offsets = [0, 64], sizes = [8, 32], strides = [1, 1]} : vector<8x128xf32> to vector<8x32xf32>
    %58 = vector.extract_strided_slice %54 {offsets = [0, 96], sizes = [8, 32], strides = [1, 1]} : vector<8x128xf32> to vector<8x32xf32>
    %59 = arith.mulf %56, %45 : vector<8x32xf32>
    %60 = arith.mulf %55, %57 : vector<8x32xf32>
    %61 = arith.addf %59, %60 : vector<8x32xf32>
    %62 = math.tanh %61 : vector<8x32xf32>
    %63 = arith.mulf %58, %62 : vector<8x32xf32>
    %64 = arith.truncf %63 : vector<8x32xf32> to vector<8x32xbf16>
    %cst_11 = arith.constant dense<0.000000e+00> : vector<8x128xf32>
    %65 = tpu.matmul %64, %29, %cst_11 {dimension_numbers = #tpu.dot_dimension_numbers<[1], [0], [0], [1], [0, 0, 1, 1], [], []>} : vector<8x32xbf16>, vector<32x128xbf16>, vector<8x128xf32> -> vector<8x128xf32>
    %66 = arith.addf %18, %65 : vector<8x128xf32>
    %67 = arith.mulf %66, %8 : vector<8x128xf32>
    %68 = math.tanh %67 : vector<8x128xf32>
    %69 = arith.mulf %68, %8 : vector<8x128xf32>
    %70 = arith.addf %69, %11 : vector<8x128xf32>
    %71 = vector.extract_strided_slice %70 {offsets = [0, 0], sizes = [8, 32], strides = [1, 1]} : vector<8x128xf32> to vector<8x32xf32>
    %72 = vector.extract_strided_slice %70 {offsets = [0, 32], sizes = [8, 32], strides = [1, 1]} : vector<8x128xf32> to vector<8x32xf32>
    %73 = vector.extract_strided_slice %70 {offsets = [0, 64], sizes = [8, 32], strides = [1, 1]} : vector<8x128xf32> to vector<8x32xf32>
    %74 = vector.extract_strided_slice %70 {offsets = [0, 96], sizes = [8, 32], strides = [1, 1]} : vector<8x128xf32> to vector<8x32xf32>
    %75 = arith.mulf %72, %61 : vector<8x32xf32>
    %76 = arith.mulf %71, %73 : vector<8x32xf32>
    %77 = arith.addf %75, %76 : vector<8x32xf32>
    %78 = math.tanh %77 : vector<8x32xf32>
    %79 = arith.mulf %74, %78 : vector<8x32xf32>
    %80 = arith.truncf %79 : vector<8x32xf32> to vector<8x32xbf16>
    %cst_12 = arith.constant dense<0.000000e+00> : vector<8x128xf32>
    %81 = tpu.matmul %80, %29, %cst_12 {dimension_numbers = #tpu.dot_dimension_numbers<[1], [0], [0], [1], [0, 0, 1, 1], [], []>} : vector<8x32xbf16>, vector<32x128xbf16>, vector<8x128xf32> -> vector<8x128xf32>
    %82 = arith.addf %20, %81 : vector<8x128xf32>
    %83 = arith.mulf %82, %8 : vector<8x128xf32>
    %84 = math.tanh %83 : vector<8x128xf32>
    %85 = arith.mulf %84, %8 : vector<8x128xf32>
    %86 = arith.addf %85, %11 : vector<8x128xf32>
    %87 = vector.extract_strided_slice %86 {offsets = [0, 0], sizes = [8, 32], strides = [1, 1]} : vector<8x128xf32> to vector<8x32xf32>
    %88 = vector.extract_strided_slice %86 {offsets = [0, 32], sizes = [8, 32], strides = [1, 1]} : vector<8x128xf32> to vector<8x32xf32>
    %89 = vector.extract_strided_slice %86 {offsets = [0, 64], sizes = [8, 32], strides = [1, 1]} : vector<8x128xf32> to vector<8x32xf32>
    %90 = vector.extract_strided_slice %86 {offsets = [0, 96], sizes = [8, 32], strides = [1, 1]} : vector<8x128xf32> to vector<8x32xf32>
    %91 = arith.mulf %88, %77 : vector<8x32xf32>
    %92 = arith.mulf %87, %89 : vector<8x32xf32>
    %93 = arith.addf %91, %92 : vector<8x32xf32>
    %94 = math.tanh %93 : vector<8x32xf32>
    %95 = arith.mulf %90, %94 : vector<8x32xf32>
    %96 = arith.truncf %95 : vector<8x32xf32> to vector<8x32xbf16>
    %cst_13 = arith.constant dense<0.000000e+00> : vector<8x128xf32>
    %97 = tpu.matmul %96, %29, %cst_13 {dimension_numbers = #tpu.dot_dimension_numbers<[1], [0], [0], [1], [0, 0, 1, 1], [], []>} : vector<8x32xbf16>, vector<32x128xbf16>, vector<8x128xf32> -> vector<8x128xf32>
    %98 = arith.addf %22, %97 : vector<8x128xf32>
    %99 = arith.mulf %98, %8 : vector<8x128xf32>
    %100 = math.tanh %99 : vector<8x128xf32>
    %101 = arith.mulf %100, %8 : vector<8x128xf32>
    %102 = arith.addf %101, %11 : vector<8x128xf32>
    %103 = vector.extract_strided_slice %102 {offsets = [0, 0], sizes = [8, 32], strides = [1, 1]} : vector<8x128xf32> to vector<8x32xf32>
    %104 = vector.extract_strided_slice %102 {offsets = [0, 32], sizes = [8, 32], strides = [1, 1]} : vector<8x128xf32> to vector<8x32xf32>
    %105 = vector.extract_strided_slice %102 {offsets = [0, 64], sizes = [8, 32], strides = [1, 1]} : vector<8x128xf32> to vector<8x32xf32>
    %106 = vector.extract_strided_slice %102 {offsets = [0, 96], sizes = [8, 32], strides = [1, 1]} : vector<8x128xf32> to vector<8x32xf32>
    %107 = arith.mulf %104, %93 : vector<8x32xf32>
    %108 = arith.mulf %103, %105 : vector<8x32xf32>
    %109 = arith.addf %107, %108 : vector<8x32xf32>
    %110 = math.tanh %109 : vector<8x32xf32>
    %111 = arith.mulf %106, %110 : vector<8x32xf32>
    %112 = arith.truncf %111 : vector<8x32xf32> to vector<8x32xbf16>
    %cst_14 = arith.constant dense<0.000000e+00> : vector<8x128xf32>
    %113 = tpu.matmul %112, %29, %cst_14 {dimension_numbers = #tpu.dot_dimension_numbers<[1], [0], [0], [1], [0, 0, 1, 1], [], []>} : vector<8x32xbf16>, vector<32x128xbf16>, vector<8x128xf32> -> vector<8x128xf32>
    %114 = arith.addf %24, %113 : vector<8x128xf32>
    %115 = arith.mulf %114, %8 : vector<8x128xf32>
    %116 = math.tanh %115 : vector<8x128xf32>
    %117 = arith.mulf %116, %8 : vector<8x128xf32>
    %118 = arith.addf %117, %11 : vector<8x128xf32>
    %119 = vector.extract_strided_slice %118 {offsets = [0, 0], sizes = [8, 32], strides = [1, 1]} : vector<8x128xf32> to vector<8x32xf32>
    %120 = vector.extract_strided_slice %118 {offsets = [0, 32], sizes = [8, 32], strides = [1, 1]} : vector<8x128xf32> to vector<8x32xf32>
    %121 = vector.extract_strided_slice %118 {offsets = [0, 64], sizes = [8, 32], strides = [1, 1]} : vector<8x128xf32> to vector<8x32xf32>
    %122 = vector.extract_strided_slice %118 {offsets = [0, 96], sizes = [8, 32], strides = [1, 1]} : vector<8x128xf32> to vector<8x32xf32>
    %123 = arith.mulf %120, %109 : vector<8x32xf32>
    %124 = arith.mulf %119, %121 : vector<8x32xf32>
    %125 = arith.addf %123, %124 : vector<8x32xf32>
    %126 = math.tanh %125 : vector<8x32xf32>
    %127 = arith.mulf %122, %126 : vector<8x32xf32>
    %128 = arith.truncf %127 : vector<8x32xf32> to vector<8x32xbf16>
    %cst_15 = arith.constant dense<0.000000e+00> : vector<8x128xf32>
    %129 = tpu.matmul %128, %29, %cst_15 {dimension_numbers = #tpu.dot_dimension_numbers<[1], [0], [0], [1], [0, 0, 1, 1], [], []>} : vector<8x32xbf16>, vector<32x128xbf16>, vector<8x128xf32> -> vector<8x128xf32>
    %130 = arith.addf %26, %129 : vector<8x128xf32>
    %131 = arith.mulf %130, %8 : vector<8x128xf32>
    %132 = math.tanh %131 : vector<8x128xf32>
    %133 = arith.mulf %132, %8 : vector<8x128xf32>
    %134 = arith.addf %133, %11 : vector<8x128xf32>
    %135 = vector.extract_strided_slice %134 {offsets = [0, 0], sizes = [8, 32], strides = [1, 1]} : vector<8x128xf32> to vector<8x32xf32>
    %136 = vector.extract_strided_slice %134 {offsets = [0, 32], sizes = [8, 32], strides = [1, 1]} : vector<8x128xf32> to vector<8x32xf32>
    %137 = vector.extract_strided_slice %134 {offsets = [0, 64], sizes = [8, 32], strides = [1, 1]} : vector<8x128xf32> to vector<8x32xf32>
    %138 = vector.extract_strided_slice %134 {offsets = [0, 96], sizes = [8, 32], strides = [1, 1]} : vector<8x128xf32> to vector<8x32xf32>
    %139 = arith.mulf %136, %125 : vector<8x32xf32>
    %140 = arith.mulf %135, %137 : vector<8x32xf32>
    %141 = arith.addf %139, %140 : vector<8x32xf32>
    %142 = math.tanh %141 : vector<8x32xf32>
    %143 = arith.mulf %138, %142 : vector<8x32xf32>
    %144 = arith.truncf %143 : vector<8x32xf32> to vector<8x32xbf16>
    %cst_16 = arith.constant dense<0.000000e+00> : vector<8x128xf32>
    %145 = tpu.matmul %144, %29, %cst_16 {dimension_numbers = #tpu.dot_dimension_numbers<[1], [0], [0], [1], [0, 0, 1, 1], [], []>} : vector<8x32xbf16>, vector<32x128xbf16>, vector<8x128xf32> -> vector<8x128xf32>
    %146 = arith.addf %28, %145 : vector<8x128xf32>
    %147 = arith.mulf %146, %8 : vector<8x128xf32>
    %148 = math.tanh %147 : vector<8x128xf32>
    %149 = arith.mulf %148, %8 : vector<8x128xf32>
    %150 = arith.addf %149, %11 : vector<8x128xf32>
    %151 = vector.extract_strided_slice %150 {offsets = [0, 0], sizes = [8, 32], strides = [1, 1]} : vector<8x128xf32> to vector<8x32xf32>
    %152 = vector.extract_strided_slice %150 {offsets = [0, 32], sizes = [8, 32], strides = [1, 1]} : vector<8x128xf32> to vector<8x32xf32>
    %153 = vector.extract_strided_slice %150 {offsets = [0, 64], sizes = [8, 32], strides = [1, 1]} : vector<8x128xf32> to vector<8x32xf32>
    %154 = vector.extract_strided_slice %150 {offsets = [0, 96], sizes = [8, 32], strides = [1, 1]} : vector<8x128xf32> to vector<8x32xf32>
    %155 = arith.mulf %152, %141 : vector<8x32xf32>
    %156 = arith.mulf %151, %153 : vector<8x32xf32>
    %157 = arith.addf %155, %156 : vector<8x32xf32>
    %158 = math.tanh %157 : vector<8x32xf32>
    %159 = arith.mulf %154, %158 : vector<8x32xf32>
    %c0_17 = arith.constant 0 : index
    %c0_18 = arith.constant 0 : index
    %160 = vector.load %arg3[%c0_17, %c0_18] : memref<32x128xbf16, #tpu.memory_space<vmem>>, vector<32x128xbf16>
    %c0_19 = arith.constant 0 : index
    %c0_20 = arith.constant 0 : index
    %161 = vector.load %arg4[%c0_19, %c0_20] : memref<32x128xbf16, #tpu.memory_space<vmem>>, vector<32x128xbf16>
    %c0_21 = arith.constant 0 : index
    %c0_22 = arith.constant 0 : index
    %162 = vector.load %arg5[%c0_21, %c0_22] : memref<1x128xf32, #tpu.memory_space<vmem>>, vector<1x128xf32>
    %163 = tpu.concatenate %47, %63, %79, %95, %111, %127, %143, %159 in 0 : vector<8x32xf32>, vector<8x32xf32>, vector<8x32xf32>, vector<8x32xf32>, vector<8x32xf32>, vector<8x32xf32>, vector<8x32xf32>, vector<8x32xf32> -> vector<64x32xf32>
    %164 = arith.truncf %163 : vector<64x32xf32> to vector<64x32xbf16>
    %cst_23 = arith.constant dense<0.000000e+00> : vector<64x128xf32>
    %165 = tpu.matmul %164, %160, %cst_23 {dimension_numbers = #tpu.dot_dimension_numbers<[1], [0], [0], [1], [0, 0, 1, 1], [], []>} : vector<64x32xbf16>, vector<32x128xbf16>, vector<64x128xf32> -> vector<64x128xf32>
    %166 = vector.broadcast %162 : vector<1x128xf32> to vector<64x128xf32>
    %167 = arith.addf %165, %166 : vector<64x128xf32>
    %168 = vector.extract_strided_slice %167 {offsets = [0, 0], sizes = [8, 128], strides = [1, 1]} : vector<64x128xf32> to vector<8x128xf32>
    %169 = vector.extract_strided_slice %167 {offsets = [8, 0], sizes = [8, 128], strides = [1, 1]} : vector<64x128xf32> to vector<8x128xf32>
    %170 = vector.extract_strided_slice %167 {offsets = [16, 0], sizes = [8, 128], strides = [1, 1]} : vector<64x128xf32> to vector<8x128xf32>
    %171 = vector.extract_strided_slice %167 {offsets = [24, 0], sizes = [8, 128], strides = [1, 1]} : vector<64x128xf32> to vector<8x128xf32>
    %172 = vector.extract_strided_slice %167 {offsets = [32, 0], sizes = [8, 128], strides = [1, 1]} : vector<64x128xf32> to vector<8x128xf32>
    %173 = vector.extract_strided_slice %167 {offsets = [40, 0], sizes = [8, 128], strides = [1, 1]} : vector<64x128xf32> to vector<8x128xf32>
    %174 = vector.extract_strided_slice %167 {offsets = [48, 0], sizes = [8, 128], strides = [1, 1]} : vector<64x128xf32> to vector<8x128xf32>
    %175 = vector.extract_strided_slice %167 {offsets = [56, 0], sizes = [8, 128], strides = [1, 1]} : vector<64x128xf32> to vector<8x128xf32>
    %cst_24 = arith.constant 0.000000e+00 : f32
    %176 = vector.broadcast %cst_24 : f32 to vector<8x32xf32>
    %cst_25 = arith.constant 0.000000e+00 : f32
    %177 = vector.broadcast %cst_25 : f32 to vector<8x32xf32>
    %178 = arith.truncf %176 : vector<8x32xf32> to vector<8x32xbf16>
    %cst_26 = arith.constant dense<0.000000e+00> : vector<8x128xf32>
    %179 = tpu.matmul %178, %161, %cst_26 {dimension_numbers = #tpu.dot_dimension_numbers<[1], [0], [0], [1], [0, 0, 1, 1], [], []>} : vector<8x32xbf16>, vector<32x128xbf16>, vector<8x128xf32> -> vector<8x128xf32>
    %180 = arith.addf %168, %179 : vector<8x128xf32>
    %181 = arith.mulf %180, %8 : vector<8x128xf32>
    %182 = math.tanh %181 : vector<8x128xf32>
    %183 = arith.mulf %182, %8 : vector<8x128xf32>
    %184 = arith.addf %183, %11 : vector<8x128xf32>
    %185 = vector.extract_strided_slice %184 {offsets = [0, 0], sizes = [8, 32], strides = [1, 1]} : vector<8x128xf32> to vector<8x32xf32>
    %186 = vector.extract_strided_slice %184 {offsets = [0, 32], sizes = [8, 32], strides = [1, 1]} : vector<8x128xf32> to vector<8x32xf32>
    %187 = vector.extract_strided_slice %184 {offsets = [0, 64], sizes = [8, 32], strides = [1, 1]} : vector<8x128xf32> to vector<8x32xf32>
    %188 = vector.extract_strided_slice %184 {offsets = [0, 96], sizes = [8, 32], strides = [1, 1]} : vector<8x128xf32> to vector<8x32xf32>
    %189 = arith.mulf %186, %177 : vector<8x32xf32>
    %190 = arith.mulf %185, %187 : vector<8x32xf32>
    %191 = arith.addf %189, %190 : vector<8x32xf32>
    %192 = math.tanh %191 : vector<8x32xf32>
    %193 = arith.mulf %188, %192 : vector<8x32xf32>
    %194 = arith.truncf %193 : vector<8x32xf32> to vector<8x32xbf16>
    %cst_27 = arith.constant dense<0.000000e+00> : vector<8x128xf32>
    %195 = tpu.matmul %194, %161, %cst_27 {dimension_numbers = #tpu.dot_dimension_numbers<[1], [0], [0], [1], [0, 0, 1, 1], [], []>} : vector<8x32xbf16>, vector<32x128xbf16>, vector<8x128xf32> -> vector<8x128xf32>
    %196 = arith.addf %169, %195 : vector<8x128xf32>
    %197 = arith.mulf %196, %8 : vector<8x128xf32>
    %198 = math.tanh %197 : vector<8x128xf32>
    %199 = arith.mulf %198, %8 : vector<8x128xf32>
    %200 = arith.addf %199, %11 : vector<8x128xf32>
    %201 = vector.extract_strided_slice %200 {offsets = [0, 0], sizes = [8, 32], strides = [1, 1]} : vector<8x128xf32> to vector<8x32xf32>
    %202 = vector.extract_strided_slice %200 {offsets = [0, 32], sizes = [8, 32], strides = [1, 1]} : vector<8x128xf32> to vector<8x32xf32>
    %203 = vector.extract_strided_slice %200 {offsets = [0, 64], sizes = [8, 32], strides = [1, 1]} : vector<8x128xf32> to vector<8x32xf32>
    %204 = vector.extract_strided_slice %200 {offsets = [0, 96], sizes = [8, 32], strides = [1, 1]} : vector<8x128xf32> to vector<8x32xf32>
    %205 = arith.mulf %202, %191 : vector<8x32xf32>
    %206 = arith.mulf %201, %203 : vector<8x32xf32>
    %207 = arith.addf %205, %206 : vector<8x32xf32>
    %208 = math.tanh %207 : vector<8x32xf32>
    %209 = arith.mulf %204, %208 : vector<8x32xf32>
    %210 = arith.truncf %209 : vector<8x32xf32> to vector<8x32xbf16>
    %cst_28 = arith.constant dense<0.000000e+00> : vector<8x128xf32>
    %211 = tpu.matmul %210, %161, %cst_28 {dimension_numbers = #tpu.dot_dimension_numbers<[1], [0], [0], [1], [0, 0, 1, 1], [], []>} : vector<8x32xbf16>, vector<32x128xbf16>, vector<8x128xf32> -> vector<8x128xf32>
    %212 = arith.addf %170, %211 : vector<8x128xf32>
    %213 = arith.mulf %212, %8 : vector<8x128xf32>
    %214 = math.tanh %213 : vector<8x128xf32>
    %215 = arith.mulf %214, %8 : vector<8x128xf32>
    %216 = arith.addf %215, %11 : vector<8x128xf32>
    %217 = vector.extract_strided_slice %216 {offsets = [0, 0], sizes = [8, 32], strides = [1, 1]} : vector<8x128xf32> to vector<8x32xf32>
    %218 = vector.extract_strided_slice %216 {offsets = [0, 32], sizes = [8, 32], strides = [1, 1]} : vector<8x128xf32> to vector<8x32xf32>
    %219 = vector.extract_strided_slice %216 {offsets = [0, 64], sizes = [8, 32], strides = [1, 1]} : vector<8x128xf32> to vector<8x32xf32>
    %220 = vector.extract_strided_slice %216 {offsets = [0, 96], sizes = [8, 32], strides = [1, 1]} : vector<8x128xf32> to vector<8x32xf32>
    %221 = arith.mulf %218, %207 : vector<8x32xf32>
    %222 = arith.mulf %217, %219 : vector<8x32xf32>
    %223 = arith.addf %221, %222 : vector<8x32xf32>
    %224 = math.tanh %223 : vector<8x32xf32>
    %225 = arith.mulf %220, %224 : vector<8x32xf32>
    %226 = arith.truncf %225 : vector<8x32xf32> to vector<8x32xbf16>
    %cst_29 = arith.constant dense<0.000000e+00> : vector<8x128xf32>
    %227 = tpu.matmul %226, %161, %cst_29 {dimension_numbers = #tpu.dot_dimension_numbers<[1], [0], [0], [1], [0, 0, 1, 1], [], []>} : vector<8x32xbf16>, vector<32x128xbf16>, vector<8x128xf32> -> vector<8x128xf32>
    %228 = arith.addf %171, %227 : vector<8x128xf32>
    %229 = arith.mulf %228, %8 : vector<8x128xf32>
    %230 = math.tanh %229 : vector<8x128xf32>
    %231 = arith.mulf %230, %8 : vector<8x128xf32>
    %232 = arith.addf %231, %11 : vector<8x128xf32>
    %233 = vector.extract_strided_slice %232 {offsets = [0, 0], sizes = [8, 32], strides = [1, 1]} : vector<8x128xf32> to vector<8x32xf32>
    %234 = vector.extract_strided_slice %232 {offsets = [0, 32], sizes = [8, 32], strides = [1, 1]} : vector<8x128xf32> to vector<8x32xf32>
    %235 = vector.extract_strided_slice %232 {offsets = [0, 64], sizes = [8, 32], strides = [1, 1]} : vector<8x128xf32> to vector<8x32xf32>
    %236 = vector.extract_strided_slice %232 {offsets = [0, 96], sizes = [8, 32], strides = [1, 1]} : vector<8x128xf32> to vector<8x32xf32>
    %237 = arith.mulf %234, %223 : vector<8x32xf32>
    %238 = arith.mulf %233, %235 : vector<8x32xf32>
    %239 = arith.addf %237, %238 : vector<8x32xf32>
    %240 = math.tanh %239 : vector<8x32xf32>
    %241 = arith.mulf %236, %240 : vector<8x32xf32>
    %242 = arith.truncf %241 : vector<8x32xf32> to vector<8x32xbf16>
    %cst_30 = arith.constant dense<0.000000e+00> : vector<8x128xf32>
    %243 = tpu.matmul %242, %161, %cst_30 {dimension_numbers = #tpu.dot_dimension_numbers<[1], [0], [0], [1], [0, 0, 1, 1], [], []>} : vector<8x32xbf16>, vector<32x128xbf16>, vector<8x128xf32> -> vector<8x128xf32>
    %244 = arith.addf %172, %243 : vector<8x128xf32>
    %245 = arith.mulf %244, %8 : vector<8x128xf32>
    %246 = math.tanh %245 : vector<8x128xf32>
    %247 = arith.mulf %246, %8 : vector<8x128xf32>
    %248 = arith.addf %247, %11 : vector<8x128xf32>
    %249 = vector.extract_strided_slice %248 {offsets = [0, 0], sizes = [8, 32], strides = [1, 1]} : vector<8x128xf32> to vector<8x32xf32>
    %250 = vector.extract_strided_slice %248 {offsets = [0, 32], sizes = [8, 32], strides = [1, 1]} : vector<8x128xf32> to vector<8x32xf32>
    %251 = vector.extract_strided_slice %248 {offsets = [0, 64], sizes = [8, 32], strides = [1, 1]} : vector<8x128xf32> to vector<8x32xf32>
    %252 = vector.extract_strided_slice %248 {offsets = [0, 96], sizes = [8, 32], strides = [1, 1]} : vector<8x128xf32> to vector<8x32xf32>
    %253 = arith.mulf %250, %239 : vector<8x32xf32>
    %254 = arith.mulf %249, %251 : vector<8x32xf32>
    %255 = arith.addf %253, %254 : vector<8x32xf32>
    %256 = math.tanh %255 : vector<8x32xf32>
    %257 = arith.mulf %252, %256 : vector<8x32xf32>
    %258 = arith.truncf %257 : vector<8x32xf32> to vector<8x32xbf16>
    %cst_31 = arith.constant dense<0.000000e+00> : vector<8x128xf32>
    %259 = tpu.matmul %258, %161, %cst_31 {dimension_numbers = #tpu.dot_dimension_numbers<[1], [0], [0], [1], [0, 0, 1, 1], [], []>} : vector<8x32xbf16>, vector<32x128xbf16>, vector<8x128xf32> -> vector<8x128xf32>
    %260 = arith.addf %173, %259 : vector<8x128xf32>
    %261 = arith.mulf %260, %8 : vector<8x128xf32>
    %262 = math.tanh %261 : vector<8x128xf32>
    %263 = arith.mulf %262, %8 : vector<8x128xf32>
    %264 = arith.addf %263, %11 : vector<8x128xf32>
    %265 = vector.extract_strided_slice %264 {offsets = [0, 0], sizes = [8, 32], strides = [1, 1]} : vector<8x128xf32> to vector<8x32xf32>
    %266 = vector.extract_strided_slice %264 {offsets = [0, 32], sizes = [8, 32], strides = [1, 1]} : vector<8x128xf32> to vector<8x32xf32>
    %267 = vector.extract_strided_slice %264 {offsets = [0, 64], sizes = [8, 32], strides = [1, 1]} : vector<8x128xf32> to vector<8x32xf32>
    %268 = vector.extract_strided_slice %264 {offsets = [0, 96], sizes = [8, 32], strides = [1, 1]} : vector<8x128xf32> to vector<8x32xf32>
    %269 = arith.mulf %266, %255 : vector<8x32xf32>
    %270 = arith.mulf %265, %267 : vector<8x32xf32>
    %271 = arith.addf %269, %270 : vector<8x32xf32>
    %272 = math.tanh %271 : vector<8x32xf32>
    %273 = arith.mulf %268, %272 : vector<8x32xf32>
    %274 = arith.truncf %273 : vector<8x32xf32> to vector<8x32xbf16>
    %cst_32 = arith.constant dense<0.000000e+00> : vector<8x128xf32>
    %275 = tpu.matmul %274, %161, %cst_32 {dimension_numbers = #tpu.dot_dimension_numbers<[1], [0], [0], [1], [0, 0, 1, 1], [], []>} : vector<8x32xbf16>, vector<32x128xbf16>, vector<8x128xf32> -> vector<8x128xf32>
    %276 = arith.addf %174, %275 : vector<8x128xf32>
    %277 = arith.mulf %276, %8 : vector<8x128xf32>
    %278 = math.tanh %277 : vector<8x128xf32>
    %279 = arith.mulf %278, %8 : vector<8x128xf32>
    %280 = arith.addf %279, %11 : vector<8x128xf32>
    %281 = vector.extract_strided_slice %280 {offsets = [0, 0], sizes = [8, 32], strides = [1, 1]} : vector<8x128xf32> to vector<8x32xf32>
    %282 = vector.extract_strided_slice %280 {offsets = [0, 32], sizes = [8, 32], strides = [1, 1]} : vector<8x128xf32> to vector<8x32xf32>
    %283 = vector.extract_strided_slice %280 {offsets = [0, 64], sizes = [8, 32], strides = [1, 1]} : vector<8x128xf32> to vector<8x32xf32>
    %284 = vector.extract_strided_slice %280 {offsets = [0, 96], sizes = [8, 32], strides = [1, 1]} : vector<8x128xf32> to vector<8x32xf32>
    %285 = arith.mulf %282, %271 : vector<8x32xf32>
    %286 = arith.mulf %281, %283 : vector<8x32xf32>
    %287 = arith.addf %285, %286 : vector<8x32xf32>
    %288 = math.tanh %287 : vector<8x32xf32>
    %289 = arith.mulf %284, %288 : vector<8x32xf32>
    %290 = arith.truncf %289 : vector<8x32xf32> to vector<8x32xbf16>
    %cst_33 = arith.constant dense<0.000000e+00> : vector<8x128xf32>
    %291 = tpu.matmul %290, %161, %cst_33 {dimension_numbers = #tpu.dot_dimension_numbers<[1], [0], [0], [1], [0, 0, 1, 1], [], []>} : vector<8x32xbf16>, vector<32x128xbf16>, vector<8x128xf32> -> vector<8x128xf32>
    %292 = arith.addf %175, %291 : vector<8x128xf32>
    %293 = arith.mulf %292, %8 : vector<8x128xf32>
    %294 = math.tanh %293 : vector<8x128xf32>
    %295 = arith.mulf %294, %8 : vector<8x128xf32>
    %296 = arith.addf %295, %11 : vector<8x128xf32>
    %297 = vector.extract_strided_slice %296 {offsets = [0, 0], sizes = [8, 32], strides = [1, 1]} : vector<8x128xf32> to vector<8x32xf32>
    %298 = vector.extract_strided_slice %296 {offsets = [0, 32], sizes = [8, 32], strides = [1, 1]} : vector<8x128xf32> to vector<8x32xf32>
    %299 = vector.extract_strided_slice %296 {offsets = [0, 64], sizes = [8, 32], strides = [1, 1]} : vector<8x128xf32> to vector<8x32xf32>
    %300 = vector.extract_strided_slice %296 {offsets = [0, 96], sizes = [8, 32], strides = [1, 1]} : vector<8x128xf32> to vector<8x32xf32>
    %301 = arith.mulf %298, %287 : vector<8x32xf32>
    %302 = arith.mulf %297, %299 : vector<8x32xf32>
    %303 = arith.addf %301, %302 : vector<8x32xf32>
    %304 = math.tanh %303 : vector<8x32xf32>
    %305 = arith.mulf %300, %304 : vector<8x32xf32>
    %306 = arith.truncf %305 : vector<8x32xf32> to vector<8x32xbf16>
    %c0_34 = arith.constant 0 : index
    %c0_35 = arith.constant 0 : index
    %307 = vector.load %arg6[%c0_34, %c0_35] : memref<32x128xbf16, #tpu.memory_space<vmem>>, vector<32x128xbf16>
    %cst_36 = arith.constant dense<0.000000e+00> : vector<8x128xf32>
    %308 = tpu.matmul %306, %307, %cst_36 {dimension_numbers = #tpu.dot_dimension_numbers<[1], [0], [0], [1], [0, 0, 1, 1], [], []>} : vector<8x32xbf16>, vector<32x128xbf16>, vector<8x128xf32> -> vector<8x128xf32>
    %c0_37 = arith.constant 0 : index
    %c0_38 = arith.constant 0 : index
    %309 = vector.load %arg7[%c0_37, %c0_38] : memref<1x128xf32, #tpu.memory_space<vmem>>, vector<1x128xf32>
    %310 = vector.broadcast %309 : vector<1x128xf32> to vector<8x128xf32>
    %311 = arith.addf %308, %310 : vector<8x128xf32>
    %c0_39 = arith.constant 0 : index
    %c0_40 = arith.constant 0 : index
    %312 = vector.load %arg8[%c0_39, %c0_40] : memref<8x128xf32, #tpu.memory_space<vmem>>, vector<8x128xf32>
    tpu.vector_store %arg8[%c0_39, %c0_40], %311 {strides = array<i32>} : memref<8x128xf32, #tpu.memory_space<vmem>>, vector<8x128xf32>,
    return
  }
  func.func @transform_0(%arg0: i32) -> (i32, i32, i32) {
    %c0_i32 = arith.constant 0 : i32
    %c0_i32_0 = arith.constant 0 : i32
    %c0_i32_1 = arith.constant 0 : i32
    return %c0_i32, %arg0, %c0_i32_0 : i32, i32, i32
  }
  func.func @transform_1(%arg0: i32) -> (i32, i32) {
    %c0_i32 = arith.constant 0 : i32
    %c0_i32_0 = arith.constant 0 : i32
    %c0_i32_1 = arith.constant 0 : i32
    return %c0_i32, %c0_i32_0 : i32, i32
  }
  func.func @transform_2(%arg0: i32) -> (i32, i32) {
    %c0_i32 = arith.constant 0 : i32
    %c0_i32_0 = arith.constant 0 : i32
    %c0_i32_1 = arith.constant 0 : i32
    return %c0_i32, %c0_i32_0 : i32, i32
  }
  func.func @transform_3(%arg0: i32) -> (i32, i32) {
    %c0_i32 = arith.constant 0 : i32
    %c0_i32_0 = arith.constant 0 : i32
    %c0_i32_1 = arith.constant 0 : i32
    return %c0_i32, %c0_i32_0 : i32, i32
  }
  func.func @transform_4(%arg0: i32) -> (i32, i32) {
    %c0_i32 = arith.constant 0 : i32
    %c0_i32_0 = arith.constant 0 : i32
    %c0_i32_1 = arith.constant 0 : i32
    return %c0_i32, %c0_i32_0 : i32, i32
  }
  func.func @transform_5(%arg0: i32) -> (i32, i32) {
    %c0_i32 = arith.constant 0 : i32
    %c0_i32_0 = arith.constant 0 : i32
    %c0_i32_1 = arith.constant 0 : i32
    return %c0_i32, %c0_i32_0 : i32, i32
  }
  func.func @transform_6(%arg0: i32) -> (i32, i32) {
    %c0_i32 = arith.constant 0 : i32
    %c0_i32_0 = arith.constant 0 : i32
    %c0_i32_1 = arith.constant 0 : i32
    return %c0_i32, %c0_i32_0 : i32, i32
  }
  func.func @transform_7(%arg0: i32) -> (i32, i32) {
    %c0_i32 = arith.constant 0 : i32
    %c0_i32_0 = arith.constant 0 : i32
    return %arg0, %c0_i32 : i32, i32
  }
}

</mosaic_0001>

<bundles_post_ra>
// kernel: tpu_custom_call.1
= control target key start
LH: loop header
LB: loop body
LE: loop exit
PB: predicated region body
PF: predicated region fallthrough
CT: control target
= control target key end

     0   :  { %12 = vsyncpa [#allocation3], 0  ;;  %s2296_s0 = inlined_call_operand.hbm [shape: f32[8,8,128], index: 0, kind: input, shape index: {}]   ;;  %s2297_s1 = inlined_call_operand.hbm [shape: bf16[32,128], index: 1, kind: input, shape index: {}]   ;;  %s2298_s2 = inlined_call_operand.hbm [shape: bf16[32,128], index: 2, kind: input, shape index: {}]   ;;  %s2299_s3 = inlined_call_operand.hbm [shape: bf16[32,128], index: 3, kind: input, shape index: {}]   ;;  %s2300_s4 = inlined_call_operand.vmem [shape: f32[1,128], index: 4, kind: input, shape index: {}]   ;;  %s2301_s5 = inlined_call_operand.hbm [shape: bf16[32,128], index: 5, kind: input, shape index: {}]   ;;  %s2302_s6 = inlined_call_operand.vmem [shape: f32[1,128], index: 6, kind: input, shape index: {}]   ;;  %s2303_s7 = inlined_call_operand.hbm [shape: f32[8,128], index: 7, kind: output, shape index: {}]  }
   0x1   :  { %13 = vsyncpa [#allocation6], 0 }
   0x2   :  { %14 = vsyncpa [#allocation9], 0 }
   0x3   :  { %15 = vsyncpa [#allocation4], 0  ;;  %s1890_s24 = smov [#allocation5]  }
   0x4   :  { %s33_s25 = sshll.u32 %s1890_s24, 4  ;;  %s34_s25 = int_to_ptr.vmem [resolvable:$true] %s33_s25 }
   0x5   :  { %s1770_s26 = scalar_lea.vmem %s34_s25, 256  ;;  %p1775_p1 = scmp.lt.s32.totalorder %s34_s25, %s34_s25 }
   0x6   :  { %p1771_p0 = scmp.ne.s32.totalorder %s34_s25, %s1770_s26  ;;  %p1776_p2 = scmp.lt.s32.totalorder %s1770_s26, %s1770_s26 }
   0x8   :  { %p1777_p3 = por %p1776_p2, %p1775_p1 }
   0xa   :  { %p1778_p4 = pnand %p1777_p3, %p1771_p0 }
   0xc   :  { %1781 = shalt.err (!%p1778_p4)
}
   0xd   :  { %s1891_s27 = smov 64   ;;  %s1892_s28 = smov 4  }
   0xe   :  { %39 = dma.hbm_to_vmem [thread:$0]  %s2297_s1, 256, %s34_s25, [#allocation6], %s1891_s27, %s1891_s27, %s1892_s28  }
   0xf   :  { %s1893_s8 = smov [#allocation8]   ;;  %s1894_s10 = smov [#allocation2]  }
  0x10   :  { %s57_s9 = sshll.u32 %s1893_s8, 4  ;;  %s21_s11 = sshll.u32 %s1894_s10, 4  ;;  %s58_s9 = int_to_ptr.vmem [resolvable:$true] %s57_s9  ;;  %s22_s11 = int_to_ptr.vmem [resolvable:$true] %s21_s11 }
  0x11   :  { %s1790_s12 = scalar_lea.vmem %s58_s9, 256  ;;  %p1795_p6 = scmp.lt.s32.totalorder %s58_s9, %s58_s9 }
  0x12   :  { %p1791_p5 = scmp.ne.s32.totalorder %s58_s9, %s1790_s12  ;;  %p1796_p7 = scmp.lt.s32.totalorder %s1790_s12, %s1790_s12 }
  0x14   :  { %p1797_p8 = por %p1796_p7, %p1795_p6 }
  0x16   :  { %p1798_p9 = pnand %p1797_p8, %p1791_p5 }
  0x18   :  { %1801 = shalt.err (!%p1798_p9)
}
  0x19   :  { %63 = dma.hbm_to_vmem [thread:$0]  %s2299_s3, 256, %s58_s9, [#allocation9], %s1891_s27, %s1891_s27, %s1892_s28  }
  0x1a   :  { %s1810_s1 = scalar_lea.vmem %s22_s11, 1024  ;;  %p1815_p11 = scmp.lt.s32.totalorder %s22_s11, %s22_s11 }
  0x1b   :  { %p1811_p10 = scmp.ne.s32.totalorder %s22_s11, %s1810_s1  ;;  %p1816_p12 = scmp.lt.s32.totalorder %s1810_s1, %s1810_s1 }
  0x1d   :  { %p1817_p13 = por %p1816_p12, %p1815_p11 }
  0x1f   :  { %p1818_p0 = pnand %p1817_p13, %p1811_p10 }
  0x21   :  { %1821 = shalt.err (!%p1818_p0)
}
  0x22   :  { %s1895_s15 = smov 128   ;;  %s1896_s16 = smov 8  }
  0x23   :  { %27 = dma.hbm_to_vmem [thread:$0]  %s2296_s0, 1024, %s22_s11, [#allocation3], %s1895_s15, %s1895_s15, %s1896_s16  }
  0x24   :  { %s1897_s19 = smov [#allocation7]   ;;  %s1898_s21 = smov [#allocation10]  }
  0x25   :  { %s45_s20 = sshll.u32 %s1897_s19, 4  ;;  %s71_s22 = sshll.u32 %s1898_s21, 4  ;;  %s46_s20 = int_to_ptr.vmem [resolvable:$true] %s45_s20  ;;  %s72_s22 = int_to_ptr.vmem [resolvable:$true] %s71_s22 }
  0x26   :  { %s1830_s3 = scalar_lea.vmem %s46_s20, 256  ;;  %p1835_p2 = scmp.lt.s32.totalorder %s46_s20, %s46_s20 }
  0x27   :  { %p1831_p1 = scmp.ne.s32.totalorder %s46_s20, %s1830_s3  ;;  %p1836_p3 = scmp.lt.s32.totalorder %s1830_s3, %s1830_s3 }
  0x29   :  { %p1837_p4 = por %p1836_p3, %p1835_p2 }
  0x2b   :  { %p1838_p5 = pnand %p1837_p4, %p1831_p1 }
  0x2d   :  { %1841 = shalt.err (!%p1838_p5)
}
  0x2e   :  { %51 = dma.hbm_to_vmem [thread:$0]  %s2298_s2, 256, %s46_s20, [#allocation6], %s1891_s27, %s1891_s27, %s1892_s28  }
  0x2f   :  { %s1850_s0 = scalar_lea.vmem %s72_s22, 256  ;;  %p1855_p7 = scmp.lt.s32.totalorder %s72_s22, %s72_s22 }
  0x30   :  { %p1851_p6 = scmp.ne.s32.totalorder %s72_s22, %s1850_s0  ;;  %p1856_p8 = scmp.lt.s32.totalorder %s1850_s0, %s1850_s0 }
  0x32   :  { %p1857_p9 = por %p1856_p8, %p1855_p7 }
  0x34   :  { %p1858_p10 = pnand %p1857_p9, %p1851_p6 }
  0x36   :  { %1861 = shalt.err (!%p1858_p10)
}
  0x37   :  { %77 = dma.hbm_to_vmem [thread:$0]  %s2301_s5, 256, %s72_s22, [#allocation9], %s1891_s27, %s1891_s27, %s1892_s28  }
  0x38   :  { %1882 = dma.done.wait [#allocation3], 1024  }
  0x39   :  { %1883 = vsyncadd [#allocation3], 4294966272 }
  0x3a   :  { %1884 = dma.done.wait [#allocation6], 512  }
  0x3b   :  { %1885 = vsyncadd [#allocation6], 4294966784 }
  0x3c   :  { %1886 = dma.done.wait [#allocation9], 512  }
  0x3d   :  { %1887 = vsyncadd [#allocation9], 4294966784  ;;  %v1899_v0 = vmov 0.0   ;;  %vm1900_vm0 = vmmov 0   ;;  %v1978_v1 = vld [vmem:[#allocation5 + $0x8] sm:$0xff]   ;;  %v1981_v2 = vld [vmem:[#allocation5] sm:$0xff]   ;;  %v96_v4 = vlaneseq }
  0x3e   :  { %1527 = vmatprep.subr.bf16.mxu0 %v1899_v0  ;;  %1531 = vmatprep.mubr.msk.bf16.mxu0 %vm1900_vm0, %v1899_v0  ;;  %v1901_v3 = vmov 0   ;;  %v103_v6 = vld [vmem:[#allocation2] sm:$0xff]  ;;  %v1902_v7 = vmov 0.5   ;;  %s1903_s2 = smov 32   ;;  %vm127_vm4 = vcmask 261120   ;;  %v104_v29 = vld [vmem:[#allocation2 + $0x8] sm:$0xff] }
  0x3f   :  { %1535 = vmatprep.subr.bf16.mxu1 %v1899_v0  ;;  %1539 = vmatprep.mubr.msk.bf16.mxu1 %vm1900_vm0, %v1899_v0  ;;  %v97_v5 = vand.u32 127, %v96_v4  ;;  %v105_v49 = vld [vmem:[#allocation2 + $0x10] sm:$0xff]  ;;  %s1904_s30 = smov [#allocation11]  }
  0x40   :  { %1528 = vmatpush3.bf16.msra.mxu0 %v1978_v1  ;;  %1536 = vmatpush3.bf16.msra.mxu1 %v1978_v1  ;;  %s1430_s8 = sshll.u32 %s1904_s30, 4  ;;  %s1431_s8 = int_to_ptr.vmem [resolvable:$true] %s1430_s8 }
  0x41   :  { %1529 = vmatprep.subr.bf16.mxu0 %v1899_v0  ;;  %1537 = vmatprep.subr.bf16.mxu1 %v1899_v0  ;;  %vm98_vm1 = vcmp.ge.s32.totalorder %v97_v5, 64  ;;  %vm99_vm2 = vcmp.lt.s32.totalorder %v97_v5, 96  ;;  %p1867_p12 = scmp.lt.s32.totalorder %s1431_s8, %s1431_s8 }
  0x42   :  { %vm100_vm3 = vmand %vm98_vm1, %vm99_vm2 }
  0x43   :  { %v1997_v8 = vsel %vm100_vm3, 1.0, %v1902_v7  ;;  %v2000_v16 = vsel %vm100_vm3, 0.0, %v1902_v7 }
  0x44   :  { %1530 = vmatpush3.bf16.msra.mxu0 %v1981_v2  ;;  %1538 = vmatpush3.bf16.msra.mxu1 %v1981_v2 }
  0x45   :  { %1543 = vmatprep.subr.bf16.mxu0 %v1899_v0  ;;  %1551 = vmatprep.subr.bf16.mxu1 %v1899_v0 }
  0x47   :  { %1532 = vmatmul.mubr.bf16.vlgmr.msra.gmra.mxu0 %v1901_v3 }
  0x48   :  { %1544 = vmatpush3.bf16.msra.mxu0 %v1978_v1  ;;  %1547 = vmatprep.mubr.msk.bf16.mxu0 %vm1900_vm0, %v1899_v0 }
  0x49   :  { %1545 = vmatprep.subr.bf16.mxu0 %v1899_v0 }
  0x4c   :  { %1546 = vmatpush3.bf16.msra.mxu0 %v1981_v2 }
  0x4d   :  { %1559 = vmatprep.subr.bf16.mxu0 %v1899_v0 }
 0x107   :  { %v165_v9 = vpop.f32.mrf.mxu0 }
 0x108   :  { %v171_v10 = vadd.f32 %v165_v9, %v103_v6 }
 0x109   :  { %v1533_v11 = vpop.f32.mrf.mxu0 }
 0x10a   :  { %v172_v12 = vmul.f32 %v171_v10, %v1997_v8  ;;  %v106_v10 = vld [vmem:[#allocation2 + $0x18] sm:$0xff] }
 0x10b   :  { %v168_v13 = vpop.f32.mrf.mxu0 }
 0x10c   :  { %1698 = vtanh.f32 %v172_v12 }
 0x10d   :  { %v1534_v14 = vpop.f32.mrf.mxu0 }
 0x119   :  { %v1699_v15 = vpop.eup %1698 }
 0x11a   :  { %v174_v17 = vmul.f32 %v1699_v15, %v1997_v8 }
 0x11c   :  { %v175_v18 = vadd.f32 %v174_v17, %v2000_v16 }
 0x11e   :  { %178 = vrot.lane.b32.xlu0 %v175_v18, %s1891_s27  ;;  %v176_v21 = vmul.f32 0.0, %v175_v18 }
 0x190   :  { %v179_v19 = vpop.permute.xlu0 %178 }
 0x191   :  { %v181_v20 = vmul.f32 %v179_v19, %v175_v18 }
 0x193   :  { %183 = vrot.lane.b32.xlu0 %v181_v20, %s1903_s2 }
 0x205   :  { %v184_v22 = vpop.permute.xlu0 %183 }
 0x206   :  { %v186_v23 = vadd.f32 %v184_v22, %v176_v21 }
 0x208   :  { %1700 = vtanh.f32 %v186_v23 }
 0x215   :  { %v1701_v24 = vpop.eup %1700 }
 0x216   :  { %189 = vrot.lane.b32.xlu1 %v1701_v24, %s1891_s27 }
 0x288   :  { %v190_v25 = vpop.permute.xlu1 %189 }
 0x289   :  { %v2007_v26 = vmul.f32 %v190_v25, %v175_v18 }
 0x28b   :  { %v193_v27 = vpack.c.bf16 %v2007_v26, %v2007_v26 }
 0x28d   :  { %195 = vrot.lane.b32.xlu1 %v193_v27, %s1903_s2 }
 0x2ff   :  { %v196_v28 = vpop.permute.xlu1 %195 }
 0x300   :  { %1540 = vmatmul.mubr.msk.bf16.vlgmr.msra.gmra.mxu1 %vm127_vm4, %v196_v28 }
 0x301   :  { %1552 = vmatpush3.bf16.msra.mxu1 %v1978_v1  ;;  %1555 = vmatprep.mubr.msk.bf16.mxu1 %vm1900_vm0, %v1899_v0 }
 0x302   :  { %1553 = vmatprep.subr.bf16.mxu1 %v1899_v0 }
 0x305   :  { %1554 = vmatpush3.bf16.msra.mxu1 %v1981_v2 }
 0x306   :  { %1567 = vmatprep.subr.bf16.mxu1 %v1899_v0 }
 0x3c0   :  { %v234_v30 = vpop.f32.mrf.mxu1 }
 0x3c1   :  { %v240_v31 = vadd.f32 %v234_v30, %v104_v29 }
 0x3c2   :  { %v1541_v32 = vpop.f32.mrf.mxu1 }
 0x3c3   :  { %v241_v33 = vmul.f32 %v240_v31, %v1997_v8  ;;  %v107_v32 = vld [vmem:[#allocation2 + $0x20] sm:$0xff] }
 0x3c4   :  { %v237_v34 = vpop.f32.mrf.mxu1 }
 0x3c5   :  { %1702 = vtanh.f32 %v241_v33 }
 0x3c6   :  { %v1542_v35 = vpop.f32.mrf.mxu1 }
 0x3d2   :  { %v1703_v36 = vpop.eup %1702 }
 0x3d3   :  { %v243_v37 = vmul.f32 %v1703_v36, %v1997_v8 }
 0x3d5   :  { %v244_v38 = vadd.f32 %v243_v37, %v2000_v16 }
 0x3d7   :  { %247 = vrot.lane.b32.xlu0 %v244_v38, %s1891_s27  ;;  %v245_v41 = vmul.f32 %v244_v38, %v186_v23 }
 0x449   :  { %v248_v39 = vpop.permute.xlu0 %247 }
 0x44a   :  { %v250_v40 = vmul.f32 %v248_v39, %v244_v38 }
 0x44c   :  { %252 = vrot.lane.b32.xlu1 %v250_v40, %s1903_s2 }
 0x4be   :  { %v253_v42 = vpop.permute.xlu1 %252 }
 0x4bf   :  { %v255_v43 = vadd.f32 %v253_v42, %v245_v41 }
 0x4c1   :  { %1704 = vtanh.f32 %v255_v43 }
 0x4ce   :  { %v1705_v44 = vpop.eup %1704 }
 0x4cf   :  { %258 = vrot.lane.b32.xlu0 %v1705_v44, %s1891_s27 }
 0x541   :  { %v259_v45 = vpop.permute.xlu0 %258 }
 0x542   :  { %v2025_v46 = vmul.f32 %v259_v45, %v244_v38 }
 0x544   :  { %v262_v47 = vpack.c.bf16 %v2025_v46, %v2025_v46 }
 0x546   :  { %264 = vrot.lane.b32.xlu1 %v262_v47, %s1903_s2 }
 0x5b8   :  { %v265_v48 = vpop.permute.xlu1 %264 }
 0x5b9   :  { %1548 = vmatmul.mubr.msk.bf16.vlgmr.msra.gmra.mxu0 %vm127_vm4, %v265_v48 }
 0x5ba   :  { %1560 = vmatpush3.bf16.msra.mxu0 %v1978_v1  ;;  %1563 = vmatprep.mubr.msk.bf16.mxu0 %vm1900_vm0, %v1899_v0 }
 0x5bb   :  { %1561 = vmatprep.subr.bf16.mxu0 %v1899_v0 }
 0x5be   :  { %1562 = vmatpush3.bf16.msra.mxu0 %v1981_v2 }
 0x5bf   :  { %1575 = vmatprep.subr.bf16.mxu0 %v1899_v0 }
 0x679   :  { %v303_v50 = vpop.f32.mrf.mxu0 }
 0x67a   :  { %v309_v51 = vadd.f32 %v303_v50, %v105_v49 }
 0x67b   :  { %v1549_v52 = vpop.f32.mrf.mxu0 }
 0x67c   :  { %v310_v53 = vmul.f32 %v309_v51, %v1997_v8 }
 0x67d   :  { %v306_v54 = vpop.f32.mrf.mxu0 }
 0x67e   :  { %1706 = vtanh.f32 %v310_v53  ;;  %v108_v53 = vld [vmem:[#allocation2 + $0x28] sm:$0xff] }
 0x67f   :  { %v1550_v55 = vpop.f32.mrf.mxu0 }
 0x68b   :  { %v1707_v56 = vpop.eup %1706 }
 0x68c   :  { %v312_v57 = vmul.f32 %v1707_v56, %v1997_v8 }
 0x68e   :  { %v313_v58 = vadd.f32 %v312_v57, %v2000_v16 }
 0x690   :  { %316 = vrot.lane.b32.xlu0 %v313_v58, %s1891_s27  ;;  %v314_v61 = vmul.f32 %v313_v58, %v255_v43 }
 0x702   :  { %v317_v59 = vpop.permute.xlu0 %316 }
 0x703   :  { %v319_v60 = vmul.f32 %v317_v59, %v313_v58 }
 0x705   :  { %321 = vrot.lane.b32.xlu1 %v319_v60, %s1903_s2 }
 0x777   :  { %v322_v62 = vpop.permute.xlu1 %321 }
 0x778   :  { %v324_v63 = vadd.f32 %v322_v62, %v314_v61 }
 0x77a   :  { %1708 = vtanh.f32 %v324_v63 }
 0x787   :  { %v1709_v4 = vpop.eup %1708 }
 0x788   :  { %327 = vrot.lane.b32.xlu0 %v1709_v4, %s1891_s27 }
 0x7fa   :  { %v328_v5 = vpop.permute.xlu0 %327 }
 0x7fb   :  { %v2043_v6 = vmul.f32 %v328_v5, %v313_v58 }
 0x7fd   :  { %v331_v7 = vpack.c.bf16 %v2043_v6, %v2043_v6 }
 0x7ff   :  { %333 = vrot.lane.b32.xlu1 %v331_v7, %s1903_s2 }
 0x871   :  { %v334_v9 = vpop.permute.xlu1 %333 }
 0x872   :  { %1556 = vmatmul.mubr.msk.bf16.vlgmr.msra.gmra.mxu1 %vm127_vm4, %v334_v9 }
 0x873   :  { %1568 = vmatpush3.bf16.msra.mxu1 %v1978_v1  ;;  %1571 = vmatprep.mubr.msk.bf16.mxu1 %vm1900_vm0, %v1899_v0 }
 0x874   :  { %1569 = vmatprep.subr.bf16.mxu1 %v1899_v0 }
 0x877   :  { %1570 = vmatpush3.bf16.msra.mxu1 %v1981_v2 }
 0x878   :  { %1583 = vmatprep.subr.bf16.mxu1 %v1899_v0 }
 0x932   :  { %v372_v11 = vpop.f32.mrf.mxu1 }
 0x933   :  { %v378_v12 = vadd.f32 %v372_v11, %v106_v10 }
 0x934   :  { %v1557_v13 = vpop.f32.mrf.mxu1 }
 0x935   :  { %v379_v14 = vmul.f32 %v378_v12, %v1997_v8  ;;  %v109_v13 = vld [vmem:[#allocation2 + $0x30] sm:$0xff] }
 0x936   :  { %v375_v15 = vpop.f32.mrf.mxu1 }
 0x937   :  { %1710 = vtanh.f32 %v379_v14 }
 0x938   :  { %v1558_v17 = vpop.f32.mrf.mxu1 }
 0x944   :  { %v1711_v18 = vpop.eup %1710 }
 0x945   :  { %v381_v19 = vmul.f32 %v1711_v18, %v1997_v8 }
 0x947   :  { %v382_v20 = vadd.f32 %v381_v19, %v2000_v16 }
 0x949   :  { %385 = vrot.lane.b32.xlu0 %v382_v20, %s1891_s27  ;;  %v383_v23 = vmul.f32 %v382_v20, %v324_v63 }
 0x9bb   :  { %v386_v21 = vpop.permute.xlu0 %385 }
 0x9bc   :  { %v388_v22 = vmul.f32 %v386_v21, %v382_v20 }
 0x9be   :  { %390 = vrot.lane.b32.xlu1 %v388_v22, %s1903_s2 }
 0xa30   :  { %v391_v24 = vpop.permute.xlu1 %390 }
 0xa31   :  { %v393_v25 = vadd.f32 %v391_v24, %v383_v23 }
 0xa33   :  { %1712 = vtanh.f32 %v393_v25 }
 0xa40   :  { %v1713_v27 = vpop.eup %1712 }
 0xa41   :  { %396 = vrot.lane.b32.xlu0 %v1713_v27, %s1891_s27 }
 0xab3   :  { %v397_v28 = vpop.permute.xlu0 %396 }
 0xab4   :  { %v2061_v29 = vmul.f32 %v397_v28, %v382_v20 }
 0xab6   :  { %v400_v30 = vpack.c.bf16 %v2061_v29, %v2061_v29 }
 0xab8   :  { %402 = vrot.lane.b32.xlu1 %v400_v30, %s1903_s2 }
 0xb2a   :  { %v403_v31 = vpop.permute.xlu1 %402 }
 0xb2b   :  { %1564 = vmatmul.mubr.msk.bf16.vlgmr.msra.gmra.mxu0 %vm127_vm4, %v403_v31  ;;  %v1692_v31 = vld [vmem:[#allocation7 + $0x8] sm:$0xff]  }
 0xb2c   :  { %1576 = vmatpush3.bf16.msra.mxu0 %v1978_v1  ;;  %1579 = vmatprep.mubr.msk.bf16.mxu0 %vm1900_vm0, %v1899_v0 }
 0xb2d   :  { %1577 = vmatprep.subr.bf16.mxu0 %v1899_v0 }
 0xb30   :  { %1578 = vmatpush3.bf16.msra.mxu0 %v1981_v2 }
 0xb31   :  { %1591 = vmatprep.subr.bf16.mxu0 %v1692_v31 }
 0xbeb   :  { %v441_v33 = vpop.f32.mrf.mxu0 }
 0xbec   :  { %v447_v34 = vadd.f32 %v441_v33, %v107_v32  ;;  %v1693_v32 = vld [vmem:[#allocation7] sm:$0xff]  }
 0xbed   :  { %v1565_v35 = vpop.f32.mrf.mxu0 }
 0xbee   :  { %v448_v36 = vmul.f32 %v447_v34, %v1997_v8  ;;  %v685_v34 = vpack.c.bf16 %v2025_v46, %v2007_v26  ;;  %v2124_v26 = vld [vmem:[#allocation8 + $0x8] sm:$0xff]  }
 0xbef   :  { %v444_v37 = vpop.f32.mrf.mxu0 }
 0xbf0   :  { %1714 = vtanh.f32 %v448_v36 }
 0xbf1   :  { %v1566_v38 = vpop.f32.mrf.mxu0 }
 0xbfd   :  { %v1715_v39 = vpop.eup %1714 }
 0xbfe   :  { %v450_v40 = vmul.f32 %v1715_v39, %v1997_v8  ;;  %v686_v39 = vpack.c.bf16 %v2061_v29, %v2043_v6 }
 0xc00   :  { %v451_v41 = vadd.f32 %v450_v40, %v2000_v16  ;;  %v2128_v40 = vld [vmem:[#allocation8] sm:$0xff]  }
 0xc02   :  { %454 = vrot.lane.b32.xlu0 %v451_v41, %s1891_s27  ;;  %v452_v44 = vmul.f32 %v451_v41, %v393_v25 }
 0xc74   :  { %v455_v42 = vpop.permute.xlu0 %454 }
 0xc75   :  { %v457_v43 = vmul.f32 %v455_v42, %v451_v41 }
 0xc77   :  { %459 = vrot.lane.b32.xlu1 %v457_v43, %s1903_s2 }
 0xce9   :  { %v460_v45 = vpop.permute.xlu1 %459 }
 0xcea   :  { %v462_v47 = vadd.f32 %v460_v45, %v452_v44 }
 0xcec   :  { %1716 = vtanh.f32 %v462_v47 }
 0xcf9   :  { %v1717_v48 = vpop.eup %1716 }
 0xcfa   :  { %465 = vrot.lane.b32.xlu0 %v1717_v48, %s1891_s27 }
 0xd6c   :  { %v466_v49 = vpop.permute.xlu0 %465 }
 0xd6d   :  { %v2078_v50 = vmul.f32 %v466_v49, %v451_v41 }
 0xd6f   :  { %v469_v51 = vpack.c.bf16 %v2078_v50, %v2078_v50 }
 0xd71   :  { %471 = vrot.lane.b32.xlu1 %v469_v51, %s1903_s2 }
 0xde3   :  { %v472_v52 = vpop.permute.xlu1 %471 }
 0xde4   :  { %1572 = vmatmul.mubr.msk.bf16.vlgmr.msra.gmra.mxu1 %vm127_vm4, %v472_v52 }
 0xde5   :  { %1584 = vmatpush3.bf16.msra.mxu1 %v1978_v1  ;;  %1587 = vmatprep.mubr.msk.bf16.mxu1 %vm1900_vm0, %v1899_v0 }
 0xde6   :  { %1585 = vmatprep.subr.bf16.mxu1 %v1899_v0 }
 0xde9   :  { %1586 = vmatpush3.bf16.msra.mxu1 %v1981_v2 }
 0xdea   :  { %1603 = vmatprep.subr.bf16.mxu1 %v1899_v0 }
 0xea4   :  { %v510_v54 = vpop.f32.mrf.mxu1 }
 0xea5   :  { %v516_v55 = vadd.f32 %v510_v54, %v108_v53 }
 0xea6   :  { %v1573_v56 = vpop.f32.mrf.mxu1 }
 0xea7   :  { %v517_v57 = vmul.f32 %v516_v55, %v1997_v8 }
 0xea8   :  { %v513_v58 = vpop.f32.mrf.mxu1 }
 0xea9   :  { %1718 = vtanh.f32 %v517_v57 }
 0xeaa   :  { %v1574_v59 = vpop.f32.mrf.mxu1 }
 0xeb6   :  { %v1719_v60 = vpop.eup %1718 }
 0xeb7   :  { %v519_v1 = vmul.f32 %v1719_v60, %v1997_v8  ;;  %v110_v60 = vld [vmem:[#allocation2 + $0x38] sm:$0xff] }
 0xeb9   :  { %v520_v61 = vadd.f32 %v519_v1, %v2000_v16 }
 0xebb   :  { %523 = vrot.lane.b32.xlu0 %v520_v61, %s1891_s27  ;;  %v521_v63 = vmul.f32 %v520_v61, %v462_v47 }
 0xf2d   :  { %v524_v62 = vpop.permute.xlu0 %523 }
 0xf2e   :  { %v526_v2 = vmul.f32 %v524_v62, %v520_v61 }
 0xf30   :  { %528 = vrot.lane.b32.xlu1 %v526_v2, %s1903_s2 }
 0xfa2   :  { %v529_v4 = vpop.permute.xlu1 %528 }
 0xfa3   :  { %v531_v5 = vadd.f32 %v529_v4, %v521_v63 }
 0xfa5   :  { %1720 = vtanh.f32 %v531_v5 }
 0xfb2   :  { %v1721_v7 = vpop.eup %1720 }
 0xfb3   :  { %534 = vrot.lane.b32.xlu0 %v1721_v7, %s1891_s27 }
0x1025   :  { %v535_v9 = vpop.permute.xlu0 %534 }
0x1026   :  { %v2096_v10 = vmul.f32 %v535_v9, %v520_v61 }
0x1028   :  { %v538_v11 = vpack.c.bf16 %v2096_v10, %v2096_v10 }
0x102a   :  { %540 = vrot.lane.b32.xlu1 %v538_v11, %s1903_s2 }
0x109c   :  { %v541_v12 = vpop.permute.xlu1 %540 }
0x109d   :  { %1580 = vmatmul.mubr.msk.bf16.vlgmr.msra.gmra.mxu0 %vm127_vm4, %v541_v12 }
0x109e   :  { %1592 = vmatpush3.bf16.msra.mxu0 %v1692_v31 }
0x109f   :  { %1593 = vmatprep.subr.bf16.mxu0 %v1693_v32 }
0x10a2   :  { %1594 = vmatpush3.bf16.msra.mxu0 %v1693_v32 }
0x10a3   :  { %1619 = vmatprep.subr.bf16.mxu0 %v1899_v0 }
0x115d   :  { %v579_v14 = vpop.f32.mrf.mxu0 }
0x115e   :  { %v585_v15 = vadd.f32 %v579_v14, %v109_v13 }
0x115f   :  { %v1581_v17 = vpop.f32.mrf.mxu0 }
0x1160   :  { %v586_v18 = vmul.f32 %v585_v15, %v1997_v8 }
0x1161   :  { %v582_v19 = vpop.f32.mrf.mxu0 }
0x1162   :  { %1722 = vtanh.f32 %v586_v18 }
0x1163   :  { %v1582_v20 = vpop.f32.mrf.mxu0 }
0x116f   :  { %v1723_v21 = vpop.eup %1722 }
0x1170   :  { %v588_v22 = vmul.f32 %v1723_v21, %v1997_v8 }
0x1172   :  { %v589_v23 = vadd.f32 %v588_v22, %v2000_v16  ;;  %v687_v22 = vpack.c.bf16 %v2096_v10, %v2078_v50 }
0x1174   :  { %592 = vrot.lane.b32.xlu0 %v589_v23, %s1891_s27  ;;  %v590_v27 = vmul.f32 %v589_v23, %v531_v5 }
0x11e6   :  { %v593_v24 = vpop.permute.xlu0 %592 }
0x11e7   :  { %v595_v25 = vmul.f32 %v593_v24, %v589_v23 }
0x11e9   :  { %597 = vrot.lane.b32.xlu1 %v595_v25, %s1903_s2 }
0x125b   :  { %v598_v28 = vpop.permute.xlu1 %597 }
0x125c   :  { %v2107_v30 = vadd.f32 %v598_v28, %v590_v27 }
0x125e   :  { %1724 = vtanh.f32 %v2107_v30 }
0x126b   :  { %v1725_v33 = vpop.eup %1724 }
0x126c   :  { %603 = vrot.lane.b32.xlu0 %v1725_v33, %s1891_s27 }
0x1270   :  { %699 = vrot.lane.b32.xlu0 %v685_v34, %s1903_s2 }
0x12de   :  { %v604_v35 = vpop.permute.xlu0 %603 }
0x12df   :  { %v2115_v36 = vmul.f32 %v604_v35, %v589_v23 }
0x12e1   :  { %v607_v37 = vpack.c.bf16 %v2115_v36, %v2115_v36 }
0x12e2   :  { %v700_v38 = vpop.permute.xlu0 %699 }
0x12e3   :  { %609 = vrot.lane.b32.xlu1 %v607_v37, %s1903_s2  ;;  %1595 = vmatprep.mubr.msk.bf16.mxu0 %vm127_vm4, %v700_v38 }
0x12e7   :  { %701 = vrot.lane.b32.xlu1 %v686_v39, %s1903_s2 }
0x1355   :  { %v610_v46 = vpop.permute.xlu1 %609 }
0x1356   :  { %1588 = vmatmul.mubr.msk.bf16.vlgmr.msra.gmra.mxu1 %vm127_vm4, %v610_v46 }
0x1357   :  { %1604 = vmatpush3.bf16.msra.mxu1 %v2124_v26  ;;  %1607 = vmatprep.mubr.msk.bf16.mxu1 %vm1900_vm0, %v1899_v0 }
0x1358   :  { %1605 = vmatprep.subr.bf16.mxu1 %v1899_v0 }
0x1359   :  { %v702_v41 = vpop.permute.xlu1 %701 }
0x135a   :  { %1596 = vmatmul.mubr.msk.bf16.vlgmr.msra.gmra.mxu0 %vm127_vm4, %v702_v41 }
0x135b   :  { %1606 = vmatpush3.bf16.msra.mxu1 %v2128_v40  ;;  %1620 = vmatpush3.bf16.msra.mxu0 %v2124_v26 }
0x135c   :  { %1611 = vmatprep.subr.bf16.mxu1 %v1899_v0  ;;  %1621 = vmatprep.subr.bf16.mxu0 %v1899_v0 }
0x135e   :  { %1608 = vmatmul.mubr.bf16.vlgmr.msra.gmra.mxu1 %v1901_v3  ;;  %v2152_v3 = vld [vmem:[%s2300_s4] ss:$0 sm:$0xff] }
0x135f   :  { %1612 = vmatpush3.bf16.msra.mxu1 %v2124_v26  ;;  %1615 = vmatprep.mubr.msk.bf16.mxu1 %vm1900_vm0, %v1899_v0 }
0x1360   :  { %1613 = vmatprep.subr.bf16.mxu1 %v1899_v0  ;;  %1622 = vmatpush3.bf16.msra.mxu0 %v2128_v40 }
0x1361   :  { %1635 = vmatprep.subr.bf16.mxu0 %v1899_v0 }
0x1363   :  { %1614 = vmatpush3.bf16.msra.mxu1 %v2128_v40 }
0x1364   :  { %1627 = vmatprep.subr.bf16.mxu1 %v1899_v0 }
0x1416   :  { %v648_v6 = vpop.f32.mrf.mxu1 }
0x1417   :  { %v654_v1 = vadd.f32 %v648_v6, %v110_v60 }
0x1418   :  { %v1589_v29 = vpop.f32.mrf.mxu1 }
0x1419   :  { %v655_v61 = vmul.f32 %v654_v1, %v1997_v8 }
0x141a   :  { %v651_v42 = vpop.f32.mrf.mxu1  ;;  %v2147_v43 = vpop.f32.mrf.mxu0 }
0x141c   :  { %v1590_v44 = vpop.f32.mrf.mxu1  ;;  %v765_v45 = vpop.f32.mrf.mxu0 }
0x141d   :  { %v766_v47 = vadd.f32 %v2152_v3, %v765_v45 }
0x141e   :  { %v842_v48 = vpop.f32.mrf.mxu1  ;;  %v2180_v25 = vpop.f32.mrf.mxu0 }
0x141f   :  { %v848_v49 = vadd.f32 %v842_v48, %v766_v47 }
0x1420   :  { %v1609_v51 = vpop.f32.mrf.mxu1  ;;  %v768_v27 = vpop.f32.mrf.mxu0 }
0x1421   :  { %v849_v52 = vmul.f32 %v848_v49, %v1997_v8  ;;  %v769_v28 = vadd.f32 %v2152_v3, %v768_v27 }
0x1422   :  { %v845_v53 = vpop.f32.mrf.mxu1 }
0x1423   :  { %1726 = vtanh.f32 %v849_v52 }
0x1424   :  { %v1610_v54 = vpop.f32.mrf.mxu1  ;;  %1728 = vtanh.f32 %v655_v61 }
0x1430   :  { %v1727_v55 = vpop.eup %1726 }
0x1431   :  { %v851_v56 = vmul.f32 %v1727_v55, %v1997_v8  ;;  %v1729_v4 = vpop.eup %1728  ;;  %v774_v55 = vadd.f32 %v2147_v43, %v2152_v3 }
0x1432   :  { %v657_v5 = vmul.f32 %v1729_v4, %v1997_v8 }
0x1433   :  { %v852_v57 = vadd.f32 %v851_v56, %v2000_v16 }
0x1434   :  { %v658_v9 = vadd.f32 %v657_v5, %v2000_v16 }
0x1435   :  { %855 = vrot.lane.b32.xlu0 %v852_v57, %s1891_s27  ;;  %v853_v62 = vmul.f32 0.0, %v852_v57 }
0x1436   :  { %v659_v18 = vmul.f32 %v658_v9, %v2107_v30 }
0x14a7   :  { %v856_v58 = vpop.permute.xlu0 %855 }
0x14a8   :  { %v858_v59 = vmul.f32 %v856_v58, %v852_v57 }
0x14aa   :  { %860 = vrot.lane.b32.xlu1 %v858_v59, %s1903_s2 }
0x151c   :  { %v861_v2 = vpop.permute.xlu1 %860 }
0x151d   :  { %v863_v63 = vadd.f32 %v861_v2, %v853_v62 }
0x151f   :  { %1730 = vtanh.f32 %v863_v63 }
0x152c   :  { %v1731_v7 = vpop.eup %1730 }
0x152d   :  { %866 = vrot.lane.b32.xlu0 %v1731_v7, %s1891_s27 }
0x1531   :  { %661 = vrot.lane.b32.xlu0 %v658_v9, %s1891_s27 }
0x159f   :  { %v867_v11 = vpop.permute.xlu0 %866 }
0x15a0   :  { %v869_v12 = vmul.f32 %v867_v11, %v852_v57 }
0x15a2   :  { %v870_v13 = vpack.c.bf16 %v869_v12, %v869_v12 }
0x15a3   :  { %v662_v14 = vpop.permute.xlu0 %661 }
0x15a4   :  { %v664_v15 = vmul.f32 %v662_v14, %v658_v9  ;;  %872 = vrot.lane.b32.xlu1 %v870_v13, %s1903_s2 }
0x15a6   :  { %666 = vrot.lane.b32.xlu0 %v664_v15, %s1903_s2  ;;  %v777_v15 = vadd.f32 %v2180_v25, %v2152_v3 }
0x1616   :  { %v873_v17 = vpop.permute.xlu1 %872 }
0x1617   :  { %1616 = vmatmul.mubr.msk.bf16.vlgmr.msra.gmra.mxu1 %vm127_vm4, %v873_v17 }
0x1618   :  { %v667_v19 = vpop.permute.xlu0 %666  ;;  %1628 = vmatpush3.bf16.msra.mxu1 %v2124_v26  ;;  %1631 = vmatprep.mubr.msk.bf16.mxu1 %vm1900_vm0, %v1899_v0 }
0x1619   :  { %v669_v20 = vadd.f32 %v667_v19, %v659_v18  ;;  %1629 = vmatprep.subr.bf16.mxu1 %v1899_v0 }
0x161b   :  { %1732 = vtanh.f32 %v669_v20 }
0x161c   :  { %1630 = vmatpush3.bf16.msra.mxu1 %v2128_v40 }
0x161d   :  { %1643 = vmatprep.subr.bf16.mxu1 %v1899_v0 }
0x1628   :  { %v1733_v21 = vpop.eup %1732 }
0x1629   :  { %672 = vrot.lane.b32.xlu0 %v1733_v21, %s1891_s27 }
0x162d   :  { %703 = vrot.lane.b32.xlu0 %v687_v22, %s1903_s2 }
0x169b   :  { %v673_v23 = vpop.permute.xlu0 %672 }
0x169c   :  { %v675_v29 = vmul.f32 %v673_v23, %v658_v9 }
0x169e   :  { %v688_v44 = vpack.c.bf16 %v675_v29, %v2115_v36 }
0x169f   :  { %v704_v24 = vpop.permute.xlu0 %703 }
0x16a0   :  { %1599 = vmatprep.mubr.msk.bf16.mxu0 %vm127_vm4, %v704_v24 }
0x16d7   :  { %v911_v30 = vpop.f32.mrf.mxu1 }
0x16d8   :  { %v917_v31 = vadd.f32 %v911_v30, %v769_v28 }
0x16d9   :  { %v1617_v32 = vpop.f32.mrf.mxu1 }
0x16da   :  { %v918_v33 = vmul.f32 %v917_v31, %v1997_v8 }
0x16db   :  { %v914_v34 = vpop.f32.mrf.mxu1 }
0x16dc   :  { %1734 = vtanh.f32 %v918_v33 }
0x16dd   :  { %v1618_v35 = vpop.f32.mrf.mxu1 }
0x16e9   :  { %v1735_v50 = vpop.eup %1734 }
0x16ea   :  { %v920_v10 = vmul.f32 %v1735_v50, %v1997_v8 }
0x16ec   :  { %v921_v37 = vadd.f32 %v920_v10, %v2000_v16 }
0x16ee   :  { %924 = vrot.lane.b32.xlu1 %v921_v37, %s1891_s27  ;;  %v922_v46 = vmul.f32 %v921_v37, %v863_v63 }
0x1760   :  { %v925_v38 = vpop.permute.xlu1 %924 }
0x1761   :  { %v927_v39 = vmul.f32 %v925_v38, %v921_v37 }
0x1763   :  { %929 = vrot.lane.b32.xlu1 %v927_v39, %s1903_s2 }
0x17d5   :  { %v930_v41 = vpop.permute.xlu1 %929 }
0x17d6   :  { %v932_v6 = vadd.f32 %v930_v41, %v922_v46 }
0x17d8   :  { %1736 = vtanh.f32 %v932_v6 }
0x17e5   :  { %v1737_v42 = vpop.eup %1736 }
0x17e6   :  { %935 = vrot.lane.b32.xlu1 %v1737_v42, %s1891_s27 }
0x17ea   :  { %705 = vrot.lane.b32.xlu1 %v688_v44, %s1903_s2 }
0x1858   :  { %v936_v45 = vpop.permute.xlu1 %935 }
0x1859   :  { %v938_v47 = vmul.f32 %v936_v45, %v921_v37 }
0x185b   :  { %v939_v48 = vpack.c.bf16 %v938_v47, %v938_v47 }
0x185c   :  { %v706_v49 = vpop.permute.xlu1 %705 }
0x185d   :  { %941 = vrot.lane.b32.xlu0 %v939_v48, %s1903_s2  ;;  %1600 = vmatmul.mubr.msk.bf16.gmra.mxu0 %vm127_vm4, %v706_v49 }
0x185e   :  { %1623 = vmatprep.mubr.msk.bf16.mxu0 %vm1900_vm0, %v1899_v0 }
0x18cf   :  { %v942_v51 = vpop.permute.xlu0 %941 }
0x18d0   :  { %1624 = vmatmul.mubr.msk.bf16.vlgmr.msra.gmra.mxu0 %vm127_vm4, %v942_v51 }
0x18d1   :  { %1636 = vmatpush3.bf16.msra.mxu0 %v2124_v26  ;;  %1639 = vmatprep.mubr.msk.bf16.mxu0 %vm1900_vm0, %v1899_v0 }
0x18d2   :  { %1637 = vmatprep.subr.bf16.mxu0 %v1899_v0 }
0x18d5   :  { %1638 = vmatpush3.bf16.msra.mxu0 %v2128_v40 }
0x18d6   :  { %1651 = vmatprep.subr.bf16.mxu0 %v1899_v0 }
0x191d   :  { %v2202_v36 = vpop.f32.mrf.mxu0 }
0x191f   :  { %v2204_v52 = vpop.f32.mrf.mxu0 }
0x1920   :  { %v782_v37 = vadd.f32 %v2152_v3, %v2204_v52 }
0x1921   :  { %v2206_v53 = vpop.f32.mrf.mxu0 }
0x1923   :  { %v2208_v54 = vpop.f32.mrf.mxu0 }
0x1990   :  { %v980_v56 = vpop.f32.mrf.mxu0 }
0x1991   :  { %v986_v57 = vadd.f32 %v980_v56, %v774_v55 }
0x1992   :  { %v1625_v58 = vpop.f32.mrf.mxu0 }
0x1993   :  { %v987_v59 = vmul.f32 %v986_v57, %v1997_v8 }
0x1994   :  { %v983_v60 = vpop.f32.mrf.mxu0 }
0x1995   :  { %1738 = vtanh.f32 %v987_v59  ;;  %v785_v60 = vadd.f32 %v2152_v3, %v2208_v54 }
0x1996   :  { %v1626_v1 = vpop.f32.mrf.mxu0 }
0x19a2   :  { %v1739_v61 = vpop.eup %1738 }
0x19a3   :  { %v989_v62 = vmul.f32 %v1739_v61, %v1997_v8 }
0x19a5   :  { %v990_v2 = vadd.f32 %v989_v62, %v2000_v16 }
0x19a7   :  { %993 = vrot.lane.b32.xlu1 %v990_v2, %s1891_s27  ;;  %v991_v43 = vmul.f32 %v990_v2, %v932_v6 }
0x1a19   :  { %v994_v63 = vpop.permute.xlu1 %993 }
0x1a1a   :  { %v996_v4 = vmul.f32 %v994_v63, %v990_v2 }
0x1a1c   :  { %998 = vrot.lane.b32.xlu0 %v996_v4, %s1903_s2 }
0x1a8e   :  { %v999_v5 = vpop.permute.xlu0 %998 }
0x1a8f   :  { %v1001_v7 = vadd.f32 %v999_v5, %v991_v43 }
0x1a91   :  { %1740 = vtanh.f32 %v1001_v7 }
0x1a9e   :  { %v1741_v9 = vpop.eup %1740 }
0x1a9f   :  { %1004 = vrot.lane.b32.xlu1 %v1741_v9, %s1891_s27 }
0x1b11   :  { %v1005_v11 = vpop.permute.xlu1 %1004 }
0x1b12   :  { %v1007_v12 = vmul.f32 %v1005_v11, %v990_v2 }
0x1b14   :  { %v1008_v13 = vpack.c.bf16 %v1007_v12, %v1007_v12 }
0x1b16   :  { %1010 = vrot.lane.b32.xlu0 %v1008_v13, %s1903_s2 }
0x1b88   :  { %v1011_v14 = vpop.permute.xlu0 %1010 }
0x1b89   :  { %1632 = vmatmul.mubr.msk.bf16.vlgmr.msra.gmra.mxu1 %vm127_vm4, %v1011_v14 }
0x1b8a   :  { %1644 = vmatpush3.bf16.msra.mxu1 %v2124_v26  ;;  %1647 = vmatprep.mubr.msk.bf16.mxu1 %vm1900_vm0, %v1899_v0 }
0x1b8b   :  { %1645 = vmatprep.subr.bf16.mxu1 %v1899_v0 }
0x1b8e   :  { %1646 = vmatpush3.bf16.msra.mxu1 %v2128_v40 }
0x1b8f   :  { %1659 = vmatprep.subr.bf16.mxu1 %v1899_v0 }
0x1c49   :  { %v1049_v17 = vpop.f32.mrf.mxu1 }
0x1c4a   :  { %v1055_v18 = vadd.f32 %v1049_v17, %v777_v15 }
0x1c4b   :  { %v1633_v19 = vpop.f32.mrf.mxu1 }
0x1c4c   :  { %v1056_v20 = vmul.f32 %v1055_v18, %v1997_v8  ;;  %v790_v18 = vadd.f32 %v2202_v36, %v2152_v3 }
0x1c4d   :  { %v1052_v21 = vpop.f32.mrf.mxu1 }
0x1c4e   :  { %1742 = vtanh.f32 %v1056_v20 }
0x1c4f   :  { %v1634_v22 = vpop.f32.mrf.mxu1 }
0x1c5b   :  { %v1743_v23 = vpop.eup %1742 }
0x1c5c   :  { %v1058_v24 = vmul.f32 %v1743_v23, %v1997_v8 }
0x1c5e   :  { %v1059_v27 = vadd.f32 %v1058_v24, %v2000_v16 }
0x1c60   :  { %1062 = vrot.lane.b32.xlu1 %v1059_v27, %s1891_s27  ;;  %v1060_v25 = vmul.f32 %v1059_v27, %v1001_v7 }
0x1cd2   :  { %v1063_v28 = vpop.permute.xlu1 %1062 }
0x1cd3   :  { %v1065_v30 = vmul.f32 %v1063_v28, %v1059_v27 }
0x1cd5   :  { %1067 = vrot.lane.b32.xlu0 %v1065_v30, %s1903_s2 }
0x1d47   :  { %v1068_v31 = vpop.permute.xlu0 %1067 }
0x1d48   :  { %v1070_v32 = vadd.f32 %v1068_v31, %v1060_v25 }
0x1d4a   :  { %1744 = vtanh.f32 %v1070_v32 }
0x1d57   :  { %v1745_v33 = vpop.eup %1744 }
0x1d58   :  { %1073 = vrot.lane.b32.xlu1 %v1745_v33, %s1891_s27 }
0x1dca   :  { %v1074_v34 = vpop.permute.xlu1 %1073 }
0x1dcb   :  { %v1076_v35 = vmul.f32 %v1074_v34, %v1059_v27 }
0x1dcd   :  { %v1077_v50 = vpack.c.bf16 %v1076_v35, %v1076_v35 }
0x1dcf   :  { %1079 = vrot.lane.b32.xlu0 %v1077_v50, %s1903_s2 }
0x1e41   :  { %v1080_v10 = vpop.permute.xlu0 %1079 }
0x1e42   :  { %1640 = vmatmul.mubr.msk.bf16.vlgmr.msra.gmra.mxu0 %vm127_vm4, %v1080_v10 }
0x1e43   :  { %1652 = vmatpush3.bf16.msra.mxu0 %v2124_v26  ;;  %1655 = vmatprep.mubr.msk.bf16.mxu0 %vm1900_vm0, %v1899_v0 }
0x1e44   :  { %1653 = vmatprep.subr.bf16.mxu0 %v1899_v0 }
0x1e47   :  { %1654 = vmatpush3.bf16.msra.mxu0 %v2128_v40 }
0x1e48   :  { %1667 = vmatprep.subr.bf16.mxu0 %v1899_v0 }
0x1f02   :  { %v1118_v38 = vpop.f32.mrf.mxu0 }
0x1f03   :  { %v1124_v39 = vadd.f32 %v1118_v38, %v782_v37  ;;  %v793_v38 = vadd.f32 %v2206_v53, %v2152_v3 }
0x1f04   :  { %v1641_v46 = vpop.f32.mrf.mxu0 }
0x1f05   :  { %v1125_v41 = vmul.f32 %v1124_v39, %v1997_v8 }
0x1f06   :  { %v1121_v6 = vpop.f32.mrf.mxu0 }
0x1f07   :  { %1746 = vtanh.f32 %v1125_v41 }
0x1f08   :  { %v1642_v29 = vpop.f32.mrf.mxu0 }
0x1f14   :  { %v1747_v42 = vpop.eup %1746 }
0x1f15   :  { %v1127_v44 = vmul.f32 %v1747_v42, %v1997_v8 }
0x1f17   :  { %v1128_v45 = vadd.f32 %v1127_v44, %v2000_v16 }
0x1f19   :  { %1131 = vrot.lane.b32.xlu1 %v1128_v45, %s1891_s27  ;;  %v1129_v49 = vmul.f32 %v1128_v45, %v1070_v32 }
0x1f8b   :  { %v1132_v47 = vpop.permute.xlu1 %1131 }
0x1f8c   :  { %v1134_v48 = vmul.f32 %v1132_v47, %v1128_v45 }
0x1f8e   :  { %1136 = vrot.lane.b32.xlu0 %v1134_v48, %s1903_s2 }
0x2000   :  { %v1137_v51 = vpop.permute.xlu0 %1136 }
0x2001   :  { %v1139_v52 = vadd.f32 %v1137_v51, %v1129_v49 }
0x2003   :  { %1748 = vtanh.f32 %v1139_v52 }
0x2010   :  { %v1749_v55 = vpop.eup %1748 }
0x2011   :  { %1142 = vrot.lane.b32.xlu1 %v1749_v55, %s1891_s27  ;;  %v1697_v55 = vld [vmem:[#allocation10] sm:$0xff]  }
0x2083   :  { %v1143_v56 = vpop.permute.xlu1 %1142 }
0x2084   :  { %v1145_v57 = vmul.f32 %v1143_v56, %v1128_v45 }
0x2086   :  { %v1146_v58 = vpack.c.bf16 %v1145_v57, %v1145_v57 }
0x2088   :  { %1148 = vrot.lane.b32.xlu0 %v1146_v58, %s1903_s2 }
0x20fa   :  { %v1149_v59 = vpop.permute.xlu0 %1148 }
0x20fb   :  { %1648 = vmatmul.mubr.msk.bf16.vlgmr.msra.gmra.mxu1 %vm127_vm4, %v1149_v59  ;;  %v1466_v59 = vld [vmem:[%s2302_s6] ss:$0 sm:$0xff] }
0x20fc   :  { %1660 = vmatpush3.bf16.msra.mxu1 %v2124_v26  ;;  %1663 = vmatprep.mubr.msk.bf16.mxu1 %vm1900_vm0, %v1899_v0 }
0x20fd   :  { %1661 = vmatprep.subr.bf16.mxu1 %v1899_v0 }
0x2100   :  { %1662 = vmatpush3.bf16.msra.mxu1 %v2128_v40 }
0x21bb   :  { %v1187_v1 = vpop.f32.mrf.mxu1 }
0x21bc   :  { %v1193_v61 = vadd.f32 %v1187_v1, %v785_v60 }
0x21bd   :  { %v1649_v62 = vpop.f32.mrf.mxu1 }
0x21be   :  { %v1194_v2 = vmul.f32 %v1193_v61, %v1997_v8 }
0x21bf   :  { %v1190_v63 = vpop.f32.mrf.mxu1 }
0x21c0   :  { %1750 = vtanh.f32 %v1194_v2 }
0x21c1   :  { %v1650_v4 = vpop.f32.mrf.mxu1 }
0x21cd   :  { %v1751_v43 = vpop.eup %1750 }
0x21ce   :  { %v1196_v26 = vmul.f32 %v1751_v43, %v1997_v8 }
0x21d0   :  { %v1197_v5 = vadd.f32 %v1196_v26, %v2000_v16 }
0x21d2   :  { %1200 = vrot.lane.b32.xlu1 %v1197_v5, %s1891_s27  ;;  %v1198_v54 = vmul.f32 %v1197_v5, %v1139_v52  ;;  %v1696_v52 = vld [vmem:[#allocation10 + $0x8] sm:$0xff]  }
0x2244   :  { %v1201_v7 = vpop.permute.xlu1 %1200 }
0x2245   :  { %v1203_v40 = vmul.f32 %v1201_v7, %v1197_v5 }
0x2247   :  { %1205 = vrot.lane.b32.xlu0 %v1203_v40, %s1903_s2 }
0x22b9   :  { %v1206_v9 = vpop.permute.xlu0 %1205 }
0x22ba   :  { %v1208_v11 = vadd.f32 %v1206_v9, %v1198_v54 }
0x22bc   :  { %1752 = vtanh.f32 %v1208_v11 }
0x22c9   :  { %v1753_v12 = vpop.eup %1752 }
0x22ca   :  { %1211 = vrot.lane.b32.xlu1 %v1753_v12, %s1891_s27 }
0x233c   :  { %v1212_v13 = vpop.permute.xlu1 %1211 }
0x233d   :  { %v1214_v14 = vmul.f32 %v1212_v13, %v1197_v5 }
0x233f   :  { %v1215_v15 = vpack.c.bf16 %v1214_v14, %v1214_v14 }
0x2341   :  { %1217 = vrot.lane.b32.xlu0 %v1215_v15, %s1903_s2 }
0x23b3   :  { %v1218_v17 = vpop.permute.xlu0 %1217 }
0x23b4   :  { %1656 = vmatmul.mubr.msk.bf16.vlgmr.msra.gmra.mxu0 %vm127_vm4, %v1218_v17 }
0x23b5   :  { %1671 = vmatprep.mubr.msk.bf16.mxu0 %vm1900_vm0, %v1899_v0  ;;  %1668 = vmatpush3.bf16.msra.mxu0 %v1696_v52 }
0x23b6   :  { %1669 = vmatprep.subr.bf16.mxu0 %v1899_v0 }
0x23b9   :  { %1670 = vmatpush3.bf16.msra.mxu0 %v1697_v55 }
0x2474   :  { %v1256_v19 = vpop.f32.mrf.mxu0 }
0x2475   :  { %v1262_v20 = vadd.f32 %v1256_v19, %v790_v18 }
0x2476   :  { %v1657_v21 = vpop.f32.mrf.mxu0 }
0x2477   :  { %v1263_v22 = vmul.f32 %v1262_v20, %v1997_v8 }
0x2478   :  { %v1259_v23 = vpop.f32.mrf.mxu0 }
0x2479   :  { %1754 = vtanh.f32 %v1263_v22 }
0x247a   :  { %v1658_v24 = vpop.f32.mrf.mxu0 }
0x2486   :  { %v1755_v27 = vpop.eup %1754 }
0x2487   :  { %v1265_v28 = vmul.f32 %v1755_v27, %v1997_v8 }
0x2489   :  { %v1266_v30 = vadd.f32 %v1265_v28, %v2000_v16 }
0x248b   :  { %1269 = vrot.lane.b32.xlu1 %v1266_v30, %s1891_s27  ;;  %v1267_v36 = vmul.f32 %v1266_v30, %v1208_v11 }
0x24fd   :  { %v1270_v25 = vpop.permute.xlu1 %1269 }
0x24fe   :  { %v1272_v31 = vmul.f32 %v1270_v25, %v1266_v30 }
0x2500   :  { %1274 = vrot.lane.b32.xlu0 %v1272_v31, %s1903_s2 }
0x2572   :  { %v1275_v32 = vpop.permute.xlu0 %1274 }
0x2573   :  { %v1277_v33 = vadd.f32 %v1275_v32, %v1267_v36 }
0x2575   :  { %1756 = vtanh.f32 %v1277_v33 }
0x2582   :  { %v1757_v34 = vpop.eup %1756 }
0x2583   :  { %1280 = vrot.lane.b32.xlu1 %v1757_v34, %s1891_s27 }
0x25f5   :  { %v1281_v35 = vpop.permute.xlu1 %1280 }
0x25f6   :  { %v1283_v50 = vmul.f32 %v1281_v35, %v1266_v30 }
0x25f8   :  { %v1284_v10 = vpack.c.bf16 %v1283_v50, %v1283_v50 }
0x25fa   :  { %1286 = vrot.lane.b32.xlu0 %v1284_v10, %s1903_s2 }
0x266c   :  { %v1287_v37 = vpop.permute.xlu0 %1286 }
0x266d   :  { %1664 = vmatmul.mubr.msk.bf16.vlgmr.msra.gmra.mxu1 %vm127_vm4, %v1287_v37 }
0x272d   :  { %v1325_v39 = vpop.f32.mrf.mxu1 }
0x272e   :  { %v1331_v46 = vadd.f32 %v1325_v39, %v793_v38 }
0x272f   :  { %v1665_v41 = vpop.f32.mrf.mxu1 }
0x2730   :  { %v1332_v6 = vmul.f32 %v1331_v46, %v1997_v8 }
0x2731   :  { %v1328_v29 = vpop.f32.mrf.mxu1 }
0x2732   :  { %1758 = vtanh.f32 %v1332_v6 }
0x2733   :  { %v1666_v42 = vpop.f32.mrf.mxu1 }
0x273f   :  { %v1759_v44 = vpop.eup %1758 }
0x2740   :  { %v1334_v45 = vmul.f32 %v1759_v44, %v1997_v8 }
0x2742   :  { %v1335_v47 = vadd.f32 %v1334_v45, %v2000_v16 }
0x2744   :  { %1338 = vrot.lane.b32.xlu1 %v1335_v47, %s1891_s27  ;;  %v1336_v3 = vmul.f32 %v1335_v47, %v1277_v33 }
0x27b6   :  { %v1339_v48 = vpop.permute.xlu1 %1338 }
0x27b7   :  { %v1341_v49 = vmul.f32 %v1339_v48, %v1335_v47 }
0x27b9   :  { %1343 = vrot.lane.b32.xlu0 %v1341_v49, %s1903_s2 }
0x282b   :  { %v1344_v53 = vpop.permute.xlu0 %1343 }
0x282c   :  { %v1346_v51 = vadd.f32 %v1344_v53, %v1336_v3 }
0x282e   :  { %1760 = vtanh.f32 %v1346_v51 }
0x283b   :  { %v1761_v56 = vpop.eup %1760 }
0x283c   :  { %1349 = vrot.lane.b32.xlu1 %v1761_v56, %s1891_s27  ;;  %s1862_s27 = scalar_lea.vmem %s1431_s8, 128 }
0x283d   :  { %p1863_p11 = scmp.ne.s32.totalorder %s1431_s8, %s1862_s27  ;;  %p1868_p13 = scmp.lt.s32.totalorder %s1862_s27, %s1862_s27 }
0x283f   :  { %p1869_p0 = por %p1868_p13, %p1867_p12 }
0x2841   :  { %p1870_p1 = pnand %p1869_p0, %p1863_p11 }
0x28ae   :  { %v1350_v8 = vpop.permute.xlu1 %1349 }
0x28af   :  { %v1352_v16 = vmul.f32 %v1350_v8, %v1335_v47 }
0x28b1   :  { %v1353_v57 = vpack.c.bf16 %v1352_v16, %v1352_v16 }
0x28b3   :  { %1366 = vrot.lane.b32.xlu0 %v1353_v57, %s1903_s2 }
0x2925   :  { %v1367_v58 = vpop.permute.xlu0 %1366 }
0x2926   :  { %1672 = vmatmul.mubr.msk.bf16.vlgmr.msra.gmra.mxu0 %vm127_vm4, %v1367_v58 }
0x29e6   :  { %v1417_v60 = vpop.f32.mrf.mxu0 }
0x29e7   :  { %v1418_v0 = vadd.f32 %v1466_v59, %v1417_v60 }
0x29e8   :  { %v1673_v1 = vpop.f32.mrf.mxu0 }
0x29e9   :  { %1423 = vst [vmem:[#allocation11] sm:$0xff] %v1418_v0 }
0x29ea   :  { %v1420_v61 = vpop.f32.mrf.mxu0 }
0x29eb   :  { %1873 = shalt.err (!%p1870_p1)
}
0x29ec   :  { %1433 = dma.vmem_to_hbm [thread:$0]  %s1431_s8, 128, %s2303_s7, [#allocation4]   ;;  %v1674_v62 = vpop.f32.mrf.mxu0 }
0x29ed   :  { %1888 = dma.done.wait [#allocation4], 128  }
0x29ee   :  { %1889 = vsyncadd [#allocation4], 4294967168 }
0x29ef   :  { %1437 = vsyncpa [#allocation3], 1 }
0x29f0   :  { %1438 = vsyncpa [#allocation6], 1 }
0x29f1   :  { %1439 = vsyncpa [#allocation9], 1 }
0x29f2   :  { %1440 = vsyncpa [#allocation4], 1 }

</bundles_post_ra>
